<compile_context>
chip_gen: v6e
topology: v6e:2x2x1
jax: 0.10.0
libtpu: 0.0.40
codegen_flags: <defaults>
</compile_context>

<pallas_src>
import numpy as np
import jax
import jax.numpy as jnp
from jax.experimental import pallas as pl
from jax.experimental.pallas import tpu as pltpu

# ---------------- configuration (consistent with the module) -----------------
B = 2                 # batch
N = 5                 # number of humans (LSTM sequence length)
SELF_DIM = 6          # self_state_dim
HUMAN_DIM = 7         # per-human state dim (LSTM input size = input_dim - self_state_dim)
INPUT_DIM = SELF_DIM + HUMAN_DIM   # 13

MLP21_DIMS = (64, 32)             # last_relu=True
ATTENTION_DIMS = (32, 32, 1)      # input = 2 * MLP21_DIMS[-1] (with_global_state=True)
MLP23_DIMS = (64, 32)             # input = MLP21_DIMS[-1] + SELF_DIM
LSTM_H = 32
MLP11_DIMS = (64, 32)             # input = SELF_DIM + LSTM_H
MLP_FINAL_DIMS = (32, 1)          # input = MLP11_DIMS[-1] + MLP23_DIMS[-1]

SLAB_COLS = 128
HALF_COLS = SLAB_COLS // 2        # 64


# ---------------- packed parameter slab layout --------------------------------
def _align8(x):
    return ((x + 7) // 8) * 8


def _build_layout():
    """Lane-packed slab layout: entries with <=64 cols share a row band
    (lanes 0:64 and 64:128).  OFFSETS[name] = (row_off, col_off, rows, cols)."""
    f = MLP21_DIMS[1]
    entries = [
        ("w21a", INPUT_DIM, MLP21_DIMS[0]), ("b21a", 1, MLP21_DIMS[0]),
        ("w21b", MLP21_DIMS[0], MLP21_DIMS[1]), ("b21b", 1, MLP21_DIMS[1]),
        ("wa1_f", f, ATTENTION_DIMS[0]), ("wa1_g", f, ATTENTION_DIMS[0]),
        ("ba1", 1, ATTENTION_DIMS[0]),
        ("wa2", ATTENTION_DIMS[0], ATTENTION_DIMS[1]), ("ba2", 1, ATTENTION_DIMS[1]),
        ("wa3", ATTENTION_DIMS[1], ATTENTION_DIMS[2]), ("ba3", 1, ATTENTION_DIMS[2]),
        ("w23a_s", SELF_DIM, MLP23_DIMS[0]), ("w23a_w", f, MLP23_DIMS[0]),
        ("b23a", 1, MLP23_DIMS[0]),
        ("w23b", MLP23_DIMS[0], MLP23_DIMS[1]), ("b23b", 1, MLP23_DIMS[1]),
        # LSTM weights stay gate-fused (i,f,g,o along lanes): full 128-lane bands
        ("wih", HUMAN_DIM, 4 * LSTM_H), ("whh", LSTM_H, 4 * LSTM_H),
        ("bl", 1, 4 * LSTM_H),
        ("w11a_s", SELF_DIM, MLP11_DIMS[0]), ("w11a_h", LSTM_H, MLP11_DIMS[0]),
        ("b11a", 1, MLP11_DIMS[0]),
        ("w11b", MLP11_DIMS[0], MLP11_DIMS[1]), ("b11b", 1, MLP11_DIMS[1]),
        ("wfa_1", MLP11_DIMS[1], MLP_FINAL_DIMS[0]),
        ("wfa_2", MLP23_DIMS[1], MLP_FINAL_DIMS[0]),
        ("bfa", 1, MLP_FINAL_DIMS[0]),
        ("wfb", MLP_FINAL_DIMS[0], MLP_FINAL_DIMS[1]), ("bfb", 1, MLP_FINAL_DIMS[1]),
    ]
    full = [(nm, r, c) for nm, r, c in entries if c > HALF_COLS]
    half = [(nm, r, c) for nm, r, c in entries if c <= HALF_COLS]
    half = sorted(half, key=lambda e: -e[1])   # stable; pair similar heights

    offsets, off = {}, 0
    for nm, r, c in full:                       # full-width bands
        offsets[nm] = (off, 0, r, c)
        off += _align8(r)
    i = 0
    while i < len(half):                        # two half-width pieces per band
        n1, r1, c1 = half[i]
        offsets[n1] = (off, 0, r1, c1)
        band = r1
        if i + 1 < len(half):
            n2, r2, c2 = half[i + 1]
            offsets[n2] = (off, HALF_COLS, r2, c2)
            band = max(r1, r2)
            i += 2
        else:
            i += 1
        off += _align8(band)
    return offsets, max(_align8(off), 8)


OFFSETS, SLAB_ROWS = _build_layout()


def pack_params(params):
    """Pack the 25 parameter arrays into one lane-packed (SLAB_ROWS, 128) f32 slab."""
    (w21a, b21a, w21b, b21b,
     wa1, ba1, wa2, ba2, wa3, ba3,
     w23a, b23a, w23b, b23b,
     wih, whh, bl,
     w11a, b11a, w11b, b11b,
     wfa, bfa, wfb, bfb) = [np.asarray(p, np.float32) for p in params]
    f = MLP21_DIMS[1]
    pieces = {
        "w21a": w21a, "b21a": b21a, "w21b": w21b, "b21b": b21b,
        "wa1_f": wa1[:f], "wa1_g": wa1[f:], "ba1": ba1,
        "wa2": wa2, "ba2": ba2, "wa3": wa3, "ba3": ba3,
        "w23a_s": w23a[:SELF_DIM], "w23a_w": w23a[SELF_DIM:], "b23a": b23a,
        "w23b": w23b, "b23b": b23b,
        "wih": wih, "whh": whh, "bl": bl,        # gate-fused (i,f,g,o along lanes)
        "w11a_s": w11a[:SELF_DIM], "w11a_h": w11a[SELF_DIM:], "b11a": b11a,
        "w11b": w11b, "b11b": b11b,
        "wfa_1": wfa[:MLP11_DIMS[1]], "wfa_2": wfa[MLP11_DIMS[1]:], "bfa": bfa,
        "wfb": wfb, "bfb": bfb,
    }
    slab = np.zeros((SLAB_ROWS, SLAB_COLS), np.float32)
    for name, (ro, co, r, c) in OFFSETS.items():
        p = pieces[name]
        assert p.shape == (r, c), (name, p.shape, (r, c))
        slab[ro:ro + r, co:co + c] = p
    return jnp.asarray(slab)


# ---------------------------- the Pallas kernel --------------------------------
def _sigmoid(x):
    # logistic via one EUP tanh (cheaper than exp + full-precision divide
    # inside the serial LSTM chain); mathematically identical to 1/(1+exp(-x)).
    return 0.5 * jnp.tanh(0.5 * x) + 0.5


def value_net_kernel(x_ref, self_ref, seq_ref, p01_ref, e_ref, w_ref, out_ref):
    f32 = jnp.float32
    n, tb, _ = seq_ref.shape              # humans (seq len), batch tile
    H = LSTM_H

    def W(name):
        ro, co, r, c = OFFSETS[name]
        return w_ref[ro:ro + r, co:co + c]     # static slice of the resident slab

    def mm(a, b):
        return jnp.dot(a, b, preferred_element_type=f32)

    x = x_ref[...]                         # (tb*n, INPUT_DIM), batch-major rows
    self_state = self_ref[...]             # (tb, SELF_DIM)
    P01 = p01_ref[...]                     # (tb, tb*n)  segment-sum matrix
    E = e_ref[...]                         # (tb*n, tb)  expansion matrix (= P01^T)

    # ---- mlp21 (last_relu=True) on every (batch, human) row ----
    h = jnp.maximum(mm(x, W("w21a")) + W("b21a"), 0.0)
    feats = jnp.maximum(mm(h, W("w21b")) + W("b21b"), 0.0)        # (rows, F)

    # ---- attention MLP: concat([feats, global_mean]) @ wa1 as split matmuls ----
    gmean = mm(P01, feats) * (1.0 / n)                  # (tb, F) mean over humans
    gterm = mm(E, mm(gmean, W("wa1_g")))                # broadcast per batch via MXU
    a = jnp.maximum(mm(feats, W("wa1_f")) + gterm + W("ba1"), 0.0)
    a = jnp.maximum(mm(a, W("wa2")) + W("ba2"), 0.0)
    scores = mm(a, W("wa3")) + W("ba3")                 # (rows, 1)

    # ---- per-batch softmax over the N humans in flat layout ----
    # Single global max: subtracting any per-segment constant cancels in the
    # normalization and keeps exp args <= 0, so this is exact and stable.
    smax = jnp.max(scores, axis=0, keepdims=True)       # (1, 1)
    e = jnp.exp(scores - smax)                          # (rows, 1)
    wsum = mm(P01, e)                                   # (tb, 1) softmax denominators
    weighted = mm(P01, e * feats) * (1.0 / wsum)        # (tb, F) weighted feature

    # ---- mlp23 on concat([self_state, weighted_feature]) via split weights ----
    x2 = jnp.maximum(mm(self_state, W("w23a_s")) + mm(weighted, W("w23a_w"))
                     + W("b23a"), 0.0)
    x2 = mm(x2, W("w23b")) + W("b23b")                  # (tb, MLP23[-1])

    # ---- LSTM over human states (batch_first, zero init, keep h_n) ----
    # Gate-fused: one input-projection matmul and one recurrent matmul per step,
    # one full-width tanh-based sigmoid + one 32-lane tanh; gate extraction is
    # cheap lane slicing (XLU slot, off the MXU/EUP path).
    wih_all = W("wih")                                  # (HUMAN_DIM, 4H)
    whh_all = W("whh")                                  # (H, 4H)
    bl_all = W("bl")                                    # (1, 4H)
    hstate = jnp.zeros((tb, H), f32)
    cstate = jnp.zeros((tb, H), f32)
    for t in range(n):                                  # n is a small compile-time constant
        gates = mm(seq_ref[t], wih_all) + mm(hstate, whh_all) + bl_all   # (tb, 4H)
        sig = _sigmoid(gates)
        i_g = sig[:, 0 * H:1 * H]
        f_g = sig[:, 1 * H:2 * H]
        o_g = sig[:, 3 * H:4 * H]
        g_g = jnp.tanh(gates[:, 2 * H:3 * H])
        cstate = f_g * cstate + i_g * g_g
        hstate = o_g * jnp.tanh(cstate)

    # ---- mlp11 on concat([self_state, h_n]) via split weights ----
    x1 = jnp.maximum(mm(self_state, W("w11a_s")) + mm(hstate, W("w11a_h"))
                     + W("b11a"), 0.0)
    x1 = mm(x1, W("w11b")) + W("b11b")                  # (tb, MLP11[-1])

    # ---- mlp_final on concat([x1, x2]) via split weights ----
    v = jnp.maximum(mm(x1, W("wfa_1")) + mm(x2, W("wfa_2")) + W("bfa"), 0.0)
    out_ref[...] = mm(v, W("wfb")) + W("bfb")           # (tb, 1)


# ---------------------------- wrapper -------------------------------------------
def _choose_tile(bp):
    """Batch tile for a (8-padded) batch bp: multiple of 8, <= 64, and >= 2 grid
    steps whenever possible so megacore ("parallel") sharding can engage."""
    if bp <= 8:
        return bp
    tb = min(64, (bp // 2) // 8 * 8)
    tb = max(tb, 8)
    while bp % tb:
        tb -= 8
    return tb


@jax.jit
def value_network(state, param_slab):
    b, n, d = state.shape
    bp = _align8(b)                                    # pad batch to a multiple of 8
    if bp != b:
        state = jnp.pad(state, ((0, bp - b), (0, 0), (0, 0)))
    tb = _choose_tile(bp)
    grid = (bp // tb,)
    rows = tb * n

    # Layout prep in the wrapper (cheap XLA ops) so the kernel never reshapes:
    x_flat = state.reshape(bp * n, d)                          # batch-major rows
    self_state = state[:, 0, :SELF_DIM]                        # (bp, SELF_DIM)
    seq_tm = jnp.transpose(state[:, :, SELF_DIM:], (1, 0, 2))  # (N, bp, HUMAN_DIM)

    # Segment matrices are identical for every batch tile: build once here and
    # pass with a constant index_map (DMA'd once per core, resident in VMEM).
    bi = jax.lax.broadcasted_iota(jnp.int32, (tb, rows), 0)
    rj = jax.lax.broadcasted_iota(jnp.int32, (tb, rows), 1)
    p01 = jnp.logical_and(rj >= bi * n, rj < (bi + 1) * n).astype(jnp.float32)
    e_mat = p01.T                                              # (rows, tb)

    out = pl.pallas_call(
        value_net_kernel,
        out_shape=jax.ShapeDtypeStruct((bp, 1), jnp.float32),
        grid_spec=pltpu.PrefetchScalarGridSpec(
            num_scalar_prefetch=0,
            grid=grid,
            in_specs=[
                pl.BlockSpec((rows, d), lambda i: (i, 0)),                 # flat rows
                pl.BlockSpec((tb, SELF_DIM), lambda i: (i, 0)),            # self state
                pl.BlockSpec((n, tb, d - SELF_DIM), lambda i: (0, i, 0)),  # seq (time-major)
                pl.BlockSpec((tb, rows), lambda i: (0, 0)),                # P01 (shared)
                pl.BlockSpec((rows, tb), lambda i: (0, 0)),                # E   (shared)
                # single lane-packed weight slab, constant index map -> resident in VMEM
                pl.BlockSpec((SLAB_ROWS, SLAB_COLS), lambda i: (0, 0)),
            ],
            out_specs=pl.BlockSpec((tb, 1), lambda i: (i, 0)),
        ),
        compiler_params=pltpu.CompilerParams(
            dimension_semantics=("parallel",)),   # batch tiles shard across TCs (v7x)
    )(x_flat, self_state, seq_tm, p01, e_mat, param_slab)
    return out[:b]


# ---------------------------- pure-JAX reference --------------------------------
def value_network_ref(state, params):
    (w21a, b21a, w21b, b21b,
     wa1, ba1, wa2, ba2, wa3, ba3,
     w23a, b23a, w23b, b23b,
     wih, whh, bl,
     w11a, b11a, w11b, b11b,
     wfa, bfa, wfb, bfb) = params
    b, n, d = state.shape
    self_state = state[:, 0, :SELF_DIM]
    x = state.reshape(b * n, d)
    h = jax.nn.relu(x @ w21a + b21a)
    mlp1 = jax.nn.relu(h @ w21b + b21b)
    feats = mlp1.reshape(b, n, -1)
    gmean = jnp.mean(feats, axis=1, keepdims=True)
    att_in = jnp.concatenate(
        [feats, jnp.broadcast_to(gmean, feats.shape)], axis=2).reshape(b * n, -1)
    a = jax.nn.relu(att_in @ wa1 + ba1)
    a = jax.nn.relu(a @ wa2 + ba2)
    scores = (a @ wa3 + ba3).reshape(b, n)
    weights = jax.nn.softmax(scores, axis=1)[:, :, None]
    weighted = jnp.sum(weights * feats, axis=1)
    joint2 = jnp.concatenate([self_state, weighted], axis=1)
    x2 = jax.nn.relu(joint2 @ w23a + b23a) @ w23b + b23b
    seq = state[:, :, SELF_DIM:]
    hs = jnp.zeros((b, LSTM_H), jnp.float32)
    cs = jnp.zeros((b, LSTM_H), jnp.float32)
    for t in range(n):
        gates = seq[:, t, :] @ wih + hs @ whh + bl
        i_g = jax.nn.sigmoid(gates[:, 0 * LSTM_H:1 * LSTM_H])
        f_g = jax.nn.sigmoid(gates[:, 1 * LSTM_H:2 * LSTM_H])
        g_g = jnp.tanh(gates[:, 2 * LSTM_H:3 * LSTM_H])
        o_g = jax.nn.sigmoid(gates[:, 3 * LSTM_H:4 * LSTM_H])
        cs = f_g * cs + i_g * g_g
        hs = o_g * jnp.tanh(cs)
    joint1 = jnp.concatenate([self_state, hs], axis=1)
    x1 = jax.nn.relu(joint1 @ w11a + b11a) @ w11b + b11b
    xf = jnp.concatenate([x1, x2], axis=1)
    return jax.nn.relu(xf @ wfa + bfa) @ wfb + bfb


# ---------------------------- parameter init ------------------------------------
def init_params(key):
    def lin(key, fan_in, fan_out, scale=0.2):
        kw, kb = jax.random.split(key)
        w = scale * jax.random.normal(kw, (fan_in, fan_out), jnp.float32)
        b = scale * jax.random.normal(kb, (1, fan_out), jnp.float32)
        return w, b

    keys = jax.random.split(key, 16)
    params = []
    # mlp21
    w, b = lin(keys[0], INPUT_DIM, MLP21_DIMS[0]); params += [w, b]
    w, b = lin(keys[1], MLP21_DIMS[0], MLP21_DIMS[1]); params += [w, b]
    # attention (input = 2 * MLP21_DIMS[-1], with_global_state=True)
    w, b = lin(keys[2], 2 * MLP21_DIMS[1], ATTENTION_DIMS[0]); params += [w, b]
    w, b = lin(keys[3], ATTENTION_DIMS[0], ATTENTION_DIMS[1]); params += [w, b]
    w, b = lin(keys[4], ATTENTION_DIMS[1], ATTENTION_DIMS[2]); params += [w, b]
    # mlp23 (input = MLP21_DIMS[-1] + SELF_DIM)
    w, b = lin(keys[5], MLP21_DIMS[1] + SELF_DIM, MLP23_DIMS[0]); params += [w, b]
    w, b = lin(keys[6], MLP23_DIMS[0], MLP23_DIMS[1]); params += [w, b]
    # LSTM (gate order i, f, g, o; combined bias = b_ih + b_hh)
    kih, khh, kb = jax.random.split(keys[7], 3)
    params += [
        0.2 * jax.random.normal(kih, (HUMAN_DIM, 4 * LSTM_H), jnp.float32),
        0.2 * jax.random.normal(khh, (LSTM_H, 4 * LSTM_H), jnp.float32),
        0.2 * jax.random.normal(kb, (1, 4 * LSTM_H), jnp.float32),
    ]
    # mlp11 (input = SELF_DIM + LSTM_H)
    w, b = lin(keys[8], SELF_DIM + LSTM_H, MLP11_DIMS[0]); params += [w, b]
    w, b = lin(keys[9], MLP11_DIMS[0], MLP11_DIMS[1]); params += [w, b]
    # mlp_final (input = MLP11_DIMS[-1] + MLP23_DIMS[-1])
    w, b = lin(keys[10], MLP11_DIMS[1] + MLP23_DIMS[1], MLP_FINAL_DIMS[0]); params += [w, b]
    w, b = lin(keys[11], MLP_FINAL_DIMS[0], MLP_FINAL_DIMS[1]); params += [w, b]
    return tuple(params)


if __name__ == "__main__":
    key = jax.random.PRNGKey(0)
    k_state, k_params = jax.random.split(key)
    state = jax.random.normal(k_state, (B, N, INPUT_DIM), jnp.float32)
    params = init_params(k_params)
    param_slab = pack_params(params)

    value = jax.block_until_ready(value_network(state, param_slab))
    ref = value_network_ref(state, params)

    assert value.shape == (B, 1), value.shape
    assert jnp.allclose(value, ref, atol=1e-4, rtol=1e-4), (value, ref)
    print("KERNEL_OK")
</pallas_src>

<mosaic_0001>
module attributes {stable_mosaic.version = 11 : i64} {
  func.func @value_net_kernel(%arg0: i32, %arg1: memref<40x13xf32, #tpu.memory_space<vmem>>, %arg2: memref<8x6xf32, #tpu.memory_space<vmem>>, %arg3: memref<5x8x7xf32, #tpu.memory_space<vmem>>, %arg4: memref<8x40xf32, #tpu.memory_space<vmem>>, %arg5: memref<40x8xf32, #tpu.memory_space<vmem>>, %arg6: memref<368x128xf32, #tpu.memory_space<vmem>>, %arg7: memref<8x1xf32, #tpu.memory_space<vmem>>) attributes {dimension_semantics = [#tpu.dimension_semantics<parallel>], iteration_bounds = array<i64: 1>, scalar_prefetch = 0 : i64, scratch_operands = 0 : i64, tpu.core_type = #tpu.core_type<tc>, window_params = [{transform_indices = @transform_0, window_bounds = array<i64: 40, 13>}, {transform_indices = @transform_1, window_bounds = array<i64: 8, 6>}, {transform_indices = @transform_2, window_bounds = array<i64: 5, 8, 7>}, {pipeline_mode = #tpu.pipeline_mode<synchronous>, transform_indices = @transform_3, window_bounds = array<i64: 8, 40>}, {pipeline_mode = #tpu.pipeline_mode<synchronous>, transform_indices = @transform_4, window_bounds = array<i64: 40, 8>}, {pipeline_mode = #tpu.pipeline_mode<synchronous>, transform_indices = @transform_5, window_bounds = array<i64: 368, 128>}, {transform_indices = @transform_6, window_bounds = array<i64: 8, 1>}]} {
    %c0 = arith.constant 0 : index
    %c0_0 = arith.constant 0 : index
    %0 = vector.load %arg1[%c0, %c0_0] : memref<40x13xf32, #tpu.memory_space<vmem>>, vector<40x13xf32>
    %c0_1 = arith.constant 0 : index
    %c0_2 = arith.constant 0 : index
    %1 = vector.load %arg2[%c0_1, %c0_2] : memref<8x6xf32, #tpu.memory_space<vmem>>, vector<8x6xf32>
    %c0_3 = arith.constant 0 : index
    %c0_4 = arith.constant 0 : index
    %2 = vector.load %arg4[%c0_3, %c0_4] : memref<8x40xf32, #tpu.memory_space<vmem>>, vector<8x40xf32>
    %c0_5 = arith.constant 0 : index
    %c0_6 = arith.constant 0 : index
    %3 = vector.load %arg5[%c0_5, %c0_6] : memref<40x8xf32, #tpu.memory_space<vmem>>, vector<40x8xf32>
    %c304 = arith.constant 304 : index
    %c0_7 = arith.constant 0 : index
    %4 = vector.load %arg6[%c304, %c0_7] : memref<368x128xf32, #tpu.memory_space<vmem>>, vector<13x64xf32>
    %cst = arith.constant dense<0.000000e+00> : vector<40x64xf32>
    %5 = tpu.matmul %0, %4, %cst {dimension_numbers = #tpu.dot_dimension_numbers<[1], [0], [0], [1], [0, 0, 1, 1], [], []>} : vector<40x13xf32>, vector<13x64xf32>, vector<40x64xf32> -> vector<40x64xf32>
    %c320 = arith.constant 320 : index
    %c64 = arith.constant 64 : index
    %6 = vector.load %arg6[%c320, %c64] : memref<368x128xf32, #tpu.memory_space<vmem>>, vector<1x64xf32>
    %7 = vector.broadcast %6 : vector<1x64xf32> to vector<40x64xf32>
    %8 = arith.addf %5, %7 : vector<40x64xf32>
    %cst_8 = arith.constant 0.000000e+00 : f32
    %9 = vector.broadcast %cst_8 : f32 to vector<40x64xf32>
    %10 = arith.maximumf %8, %9 : vector<40x64xf32>
    %c48 = arith.constant 48 : index
    %c0_9 = arith.constant 0 : index
    %11 = vector.load %arg6[%c48, %c0_9] : memref<368x128xf32, #tpu.memory_space<vmem>>, vector<64x32xf32>
    %cst_10 = arith.constant dense<0.000000e+00> : vector<40x32xf32>
    %12 = tpu.matmul %10, %11, %cst_10 {dimension_numbers = #tpu.dot_dimension_numbers<[1], [0], [0], [1], [0, 0, 1, 1], [], []>} : vector<40x64xf32>, vector<64x32xf32>, vector<40x32xf32> -> vector<40x32xf32>
    %c328 = arith.constant 328 : index
    %c0_11 = arith.constant 0 : index
    %13 = vector.load %arg6[%c328, %c0_11] : memref<368x128xf32, #tpu.memory_space<vmem>>, vector<1x32xf32>
    %14 = vector.broadcast %13 : vector<1x32xf32> to vector<40x32xf32>
    %15 = arith.addf %12, %14 : vector<40x32xf32>
    %cst_12 = arith.constant 0.000000e+00 : f32
    %16 = vector.broadcast %cst_12 : f32 to vector<40x32xf32>
    %17 = arith.maximumf %15, %16 : vector<40x32xf32>
    %cst_13 = arith.constant dense<0.000000e+00> : vector<8x32xf32>
    %18 = tpu.matmul %2, %17, %cst_13 {dimension_numbers = #tpu.dot_dimension_numbers<[1], [0], [0], [1], [0, 0, 1, 1], [], []>} : vector<8x40xf32>, vector<40x32xf32>, vector<8x32xf32> -> vector<8x32xf32>
    %cst_14 = arith.constant 2.000000e-01 : f32
    %19 = vector.broadcast %cst_14 : f32 to vector<8x32xf32>
    %20 = arith.mulf %18, %19 : vector<8x32xf32>
    %c176 = arith.constant 176 : index
    %c0_15 = arith.constant 0 : index
    %21 = vector.load %arg6[%c176, %c0_15] : memref<368x128xf32, #tpu.memory_space<vmem>>, vector<32x32xf32>
    %cst_16 = arith.constant dense<0.000000e+00> : vector<8x32xf32>
    %22 = tpu.matmul %20, %21, %cst_16 {dimension_numbers = #tpu.dot_dimension_numbers<[1], [0], [0], [1], [0, 0, 1, 1], [], []>} : vector<8x32xf32>, vector<32x32xf32>, vector<8x32xf32> -> vector<8x32xf32>
    %cst_17 = arith.constant dense<0.000000e+00> : vector<40x32xf32>
    %23 = tpu.matmul %3, %22, %cst_17 {dimension_numbers = #tpu.dot_dimension_numbers<[1], [0], [0], [1], [0, 0, 1, 1], [], []>} : vector<40x8xf32>, vector<8x32xf32>, vector<40x32xf32> -> vector<40x32xf32>
    %c112 = arith.constant 112 : index
    %c64_18 = arith.constant 64 : index
    %24 = vector.load %arg6[%c112, %c64_18] : memref<368x128xf32, #tpu.memory_space<vmem>>, vector<32x32xf32>
    %cst_19 = arith.constant dense<0.000000e+00> : vector<40x32xf32>
    %25 = tpu.matmul %17, %24, %cst_19 {dimension_numbers = #tpu.dot_dimension_numbers<[1], [0], [0], [1], [0, 0, 1, 1], [], []>} : vector<40x32xf32>, vector<32x32xf32>, vector<40x32xf32> -> vector<40x32xf32>
    %26 = arith.addf %25, %23 : vector<40x32xf32>
    %c328_20 = arith.constant 328 : index
    %c64_21 = arith.constant 64 : index
    %27 = vector.load %arg6[%c328_20, %c64_21] : memref<368x128xf32, #tpu.memory_space<vmem>>, vector<1x32xf32>
    %28 = vector.broadcast %27 : vector<1x32xf32> to vector<40x32xf32>
    %29 = arith.addf %26, %28 : vector<40x32xf32>
    %cst_22 = arith.constant 0.000000e+00 : f32
    %30 = vector.broadcast %cst_22 : f32 to vector<40x32xf32>
    %31 = arith.maximumf %29, %30 : vector<40x32xf32>
    %c176_23 = arith.constant 176 : index
    %c64_24 = arith.constant 64 : index
    %32 = vector.load %arg6[%c176_23, %c64_24] : memref<368x128xf32, #tpu.memory_space<vmem>>, vector<32x32xf32>
    %cst_25 = arith.constant dense<0.000000e+00> : vector<40x32xf32>
    %33 = tpu.matmul %31, %32, %cst_25 {dimension_numbers = #tpu.dot_dimension_numbers<[1], [0], [0], [1], [0, 0, 1, 1], [], []>} : vector<40x32xf32>, vector<32x32xf32>, vector<40x32xf32> -> vector<40x32xf32>
    %c336 = arith.constant 336 : index
    %c0_26 = arith.constant 0 : index
    %34 = vector.load %arg6[%c336, %c0_26] : memref<368x128xf32, #tpu.memory_space<vmem>>, vector<1x32xf32>
    %35 = vector.broadcast %34 : vector<1x32xf32> to vector<40x32xf32>
    %36 = arith.addf %33, %35 : vector<40x32xf32>
    %cst_27 = arith.constant 0.000000e+00 : f32
    %37 = vector.broadcast %cst_27 : f32 to vector<40x32xf32>
    %38 = arith.maximumf %36, %37 : vector<40x32xf32>
    %c208 = arith.constant 208 : index
    %c0_28 = arith.constant 0 : index
    %39 = vector.load %arg6[%c208, %c0_28] : memref<368x128xf32, #tpu.memory_space<vmem>>, vector<32x1xf32>
    %cst_29 = arith.constant dense<0.000000e+00> : vector<40x1xf32>
    %40 = tpu.matmul %38, %39, %cst_29 {dimension_numbers = #tpu.dot_dimension_numbers<[1], [0], [0], [1], [0, 0, 1, 1], [], []>} : vector<40x32xf32>, vector<32x1xf32>, vector<40x1xf32> -> vector<40x1xf32>
    %c336_30 = arith.constant 336 : index
    %c64_31 = arith.constant 64 : index
    %41 = vector.load %arg6[%c336_30, %c64_31] : memref<368x128xf32, #tpu.memory_space<vmem>>, vector<1x1xf32>
    %42 = vector.broadcast %41 : vector<1x1xf32> to vector<40x1xf32>
    %43 = arith.addf %40, %42 : vector<40x1xf32>
    %cst_32 = arith.constant dense<0xFF800000> : vector<1xf32>
    %44 = vector.multi_reduction <maximumf>, %43, %cst_32 [0] : vector<40x1xf32> to vector<1xf32>
    %45 = vector.shape_cast %44 : vector<1xf32> to vector<1x1xf32>
    %46 = vector.broadcast %45 : vector<1x1xf32> to vector<40x1xf32>
    %47 = arith.subf %43, %46 : vector<40x1xf32>
    %48 = math.exp %47 : vector<40x1xf32>
    %cst_33 = arith.constant dense<0.000000e+00> : vector<8x1xf32>
    %49 = tpu.matmul %2, %48, %cst_33 {dimension_numbers = #tpu.dot_dimension_numbers<[1], [0], [0], [1], [0, 0, 1, 1], [], []>} : vector<8x40xf32>, vector<40x1xf32>, vector<8x1xf32> -> vector<8x1xf32>
    %50 = vector.broadcast %48 : vector<40x1xf32> to vector<40x32xf32>
    %51 = arith.mulf %50, %17 : vector<40x32xf32>
    %cst_34 = arith.constant dense<0.000000e+00> : vector<8x32xf32>
    %52 = tpu.matmul %2, %51, %cst_34 {dimension_numbers = #tpu.dot_dimension_numbers<[1], [0], [0], [1], [0, 0, 1, 1], [], []>} : vector<8x40xf32>, vector<40x32xf32>, vector<8x32xf32> -> vector<8x32xf32>
    %cst_35 = arith.constant 1.000000e+00 : f32
    %53 = vector.broadcast %cst_35 : f32 to vector<8x1xf32>
    %54 = arith.divf %53, %49 : vector<8x1xf32>
    %55 = vector.broadcast %54 : vector<8x1xf32> to vector<8x32xf32>
    %56 = arith.mulf %52, %55 : vector<8x32xf32>
    %c304_36 = arith.constant 304 : index
    %c64_37 = arith.constant 64 : index
    %57 = vector.load %arg6[%c304_36, %c64_37] : memref<368x128xf32, #tpu.memory_space<vmem>>, vector<6x64xf32>
    %cst_38 = arith.constant dense<0.000000e+00> : vector<8x64xf32>
    %58 = tpu.matmul %1, %57, %cst_38 {dimension_numbers = #tpu.dot_dimension_numbers<[1], [0], [0], [1], [0, 0, 1, 1], [], []>} : vector<8x6xf32>, vector<6x64xf32>, vector<8x64xf32> -> vector<8x64xf32>
    %c208_39 = arith.constant 208 : index
    %c64_40 = arith.constant 64 : index
    %59 = vector.load %arg6[%c208_39, %c64_40] : memref<368x128xf32, #tpu.memory_space<vmem>>, vector<32x64xf32>
    %cst_41 = arith.constant dense<0.000000e+00> : vector<8x64xf32>
    %60 = tpu.matmul %56, %59, %cst_41 {dimension_numbers = #tpu.dot_dimension_numbers<[1], [0], [0], [1], [0, 0, 1, 1], [], []>} : vector<8x32xf32>, vector<32x64xf32>, vector<8x64xf32> -> vector<8x64xf32>
    %61 = arith.addf %58, %60 : vector<8x64xf32>
    %c344 = arith.constant 344 : index
    %c0_42 = arith.constant 0 : index
    %62 = vector.load %arg6[%c344, %c0_42] : memref<368x128xf32, #tpu.memory_space<vmem>>, vector<1x64xf32>
    %63 = vector.broadcast %62 : vector<1x64xf32> to vector<8x64xf32>
    %64 = arith.addf %61, %63 : vector<8x64xf32>
    %cst_43 = arith.constant 0.000000e+00 : f32
    %65 = vector.broadcast %cst_43 : f32 to vector<8x64xf32>
    %66 = arith.maximumf %64, %65 : vector<8x64xf32>
    %c48_44 = arith.constant 48 : index
    %c64_45 = arith.constant 64 : index
    %67 = vector.load %arg6[%c48_44, %c64_45] : memref<368x128xf32, #tpu.memory_space<vmem>>, vector<64x32xf32>
    %cst_46 = arith.constant dense<0.000000e+00> : vector<8x32xf32>
    %68 = tpu.matmul %66, %67, %cst_46 {dimension_numbers = #tpu.dot_dimension_numbers<[1], [0], [0], [1], [0, 0, 1, 1], [], []>} : vector<8x64xf32>, vector<64x32xf32>, vector<8x32xf32> -> vector<8x32xf32>
    %c344_47 = arith.constant 344 : index
    %c64_48 = arith.constant 64 : index
    %69 = vector.load %arg6[%c344_47, %c64_48] : memref<368x128xf32, #tpu.memory_space<vmem>>, vector<1x32xf32>
    %70 = vector.broadcast %69 : vector<1x32xf32> to vector<8x32xf32>
    %71 = arith.addf %68, %70 : vector<8x32xf32>
    %c0_49 = arith.constant 0 : index
    %c0_50 = arith.constant 0 : index
    %72 = vector.load %arg6[%c0_49, %c0_50] : memref<368x128xf32, #tpu.memory_space<vmem>>, vector<7x128xf32>
    %c8 = arith.constant 8 : index
    %c0_51 = arith.constant 0 : index
    %73 = vector.load %arg6[%c8, %c0_51] : memref<368x128xf32, #tpu.memory_space<vmem>>, vector<32x128xf32>
    %c40 = arith.constant 40 : index
    %c0_52 = arith.constant 0 : index
    %74 = vector.load %arg6[%c40, %c0_52] : memref<368x128xf32, #tpu.memory_space<vmem>>, vector<1x128xf32>
    %cst_53 = arith.constant 0.000000e+00 : f32
    %75 = vector.broadcast %cst_53 : f32 to vector<8x32xf32>
    %cst_54 = arith.constant 0.000000e+00 : f32
    %76 = vector.broadcast %cst_54 : f32 to vector<8x32xf32>
    %c0_55 = arith.constant 0 : index
    %c0_56 = arith.constant 0 : index
    %c0_57 = arith.constant 0 : index
    %77 = vector.load %arg3[%c0_55, %c0_56, %c0_57] : memref<5x8x7xf32, #tpu.memory_space<vmem>>, vector<1x8x7xf32>
    %78 = vector.shape_cast %77 : vector<1x8x7xf32> to vector<8x7xf32>
    %cst_58 = arith.constant dense<0.000000e+00> : vector<8x128xf32>
    %79 = tpu.matmul %78, %72, %cst_58 {dimension_numbers = #tpu.dot_dimension_numbers<[1], [0], [0], [1], [0, 0, 1, 1], [], []>} : vector<8x7xf32>, vector<7x128xf32>, vector<8x128xf32> -> vector<8x128xf32>
    %cst_59 = arith.constant dense<0.000000e+00> : vector<8x128xf32>
    %80 = tpu.matmul %75, %73, %cst_59 {dimension_numbers = #tpu.dot_dimension_numbers<[1], [0], [0], [1], [0, 0, 1, 1], [], []>} : vector<8x32xf32>, vector<32x128xf32>, vector<8x128xf32> -> vector<8x128xf32>
    %81 = arith.addf %79, %80 : vector<8x128xf32>
    %82 = vector.broadcast %74 : vector<1x128xf32> to vector<8x128xf32>
    %83 = arith.addf %81, %82 : vector<8x128xf32>
    %cst_60 = arith.constant 5.000000e-01 : f32
    %84 = vector.broadcast %cst_60 : f32 to vector<8x128xf32>
    %85 = arith.mulf %84, %83 : vector<8x128xf32>
    %86 = math.tanh %85 : vector<8x128xf32>
    %cst_61 = arith.constant 5.000000e-01 : f32
    %87 = vector.broadcast %cst_61 : f32 to vector<8x128xf32>
    %88 = arith.mulf %87, %86 : vector<8x128xf32>
    %cst_62 = arith.constant 5.000000e-01 : f32
    %89 = vector.broadcast %cst_62 : f32 to vector<8x128xf32>
    %90 = arith.addf %88, %89 : vector<8x128xf32>
    %91 = vector.extract_strided_slice %90 {offsets = [0, 0], sizes = [8, 32], strides = [1, 1]} : vector<8x128xf32> to vector<8x32xf32>
    %92 = vector.extract_strided_slice %90 {offsets = [0, 32], sizes = [8, 32], strides = [1, 1]} : vector<8x128xf32> to vector<8x32xf32>
    %93 = vector.extract_strided_slice %90 {offsets = [0, 96], sizes = [8, 32], strides = [1, 1]} : vector<8x128xf32> to vector<8x32xf32>
    %94 = vector.extract_strided_slice %83 {offsets = [0, 64], sizes = [8, 32], strides = [1, 1]} : vector<8x128xf32> to vector<8x32xf32>
    %95 = math.tanh %94 : vector<8x32xf32>
    %96 = arith.mulf %92, %76 : vector<8x32xf32>
    %97 = arith.mulf %91, %95 : vector<8x32xf32>
    %98 = arith.addf %96, %97 : vector<8x32xf32>
    %99 = math.tanh %98 : vector<8x32xf32>
    %100 = arith.mulf %93, %99 : vector<8x32xf32>
    %c1 = arith.constant 1 : index
    %c0_63 = arith.constant 0 : index
    %c0_64 = arith.constant 0 : index
    %101 = vector.load %arg3[%c1, %c0_63, %c0_64] : memref<5x8x7xf32, #tpu.memory_space<vmem>>, vector<1x8x7xf32>
    %102 = vector.shape_cast %101 : vector<1x8x7xf32> to vector<8x7xf32>
    %cst_65 = arith.constant dense<0.000000e+00> : vector<8x128xf32>
    %103 = tpu.matmul %102, %72, %cst_65 {dimension_numbers = #tpu.dot_dimension_numbers<[1], [0], [0], [1], [0, 0, 1, 1], [], []>} : vector<8x7xf32>, vector<7x128xf32>, vector<8x128xf32> -> vector<8x128xf32>
    %cst_66 = arith.constant dense<0.000000e+00> : vector<8x128xf32>
    %104 = tpu.matmul %100, %73, %cst_66 {dimension_numbers = #tpu.dot_dimension_numbers<[1], [0], [0], [1], [0, 0, 1, 1], [], []>} : vector<8x32xf32>, vector<32x128xf32>, vector<8x128xf32> -> vector<8x128xf32>
    %105 = arith.addf %103, %104 : vector<8x128xf32>
    %106 = vector.broadcast %74 : vector<1x128xf32> to vector<8x128xf32>
    %107 = arith.addf %105, %106 : vector<8x128xf32>
    %cst_67 = arith.constant 5.000000e-01 : f32
    %108 = vector.broadcast %cst_67 : f32 to vector<8x128xf32>
    %109 = arith.mulf %108, %107 : vector<8x128xf32>
    %110 = math.tanh %109 : vector<8x128xf32>
    %cst_68 = arith.constant 5.000000e-01 : f32
    %111 = vector.broadcast %cst_68 : f32 to vector<8x128xf32>
    %112 = arith.mulf %111, %110 : vector<8x128xf32>
    %cst_69 = arith.constant 5.000000e-01 : f32
    %113 = vector.broadcast %cst_69 : f32 to vector<8x128xf32>
    %114 = arith.addf %112, %113 : vector<8x128xf32>
    %115 = vector.extract_strided_slice %114 {offsets = [0, 0], sizes = [8, 32], strides = [1, 1]} : vector<8x128xf32> to vector<8x32xf32>
    %116 = vector.extract_strided_slice %114 {offsets = [0, 32], sizes = [8, 32], strides = [1, 1]} : vector<8x128xf32> to vector<8x32xf32>
    %117 = vector.extract_strided_slice %114 {offsets = [0, 96], sizes = [8, 32], strides = [1, 1]} : vector<8x128xf32> to vector<8x32xf32>
    %118 = vector.extract_strided_slice %107 {offsets = [0, 64], sizes = [8, 32], strides = [1, 1]} : vector<8x128xf32> to vector<8x32xf32>
    %119 = math.tanh %118 : vector<8x32xf32>
    %120 = arith.mulf %116, %98 : vector<8x32xf32>
    %121 = arith.mulf %115, %119 : vector<8x32xf32>
    %122 = arith.addf %120, %121 : vector<8x32xf32>
    %123 = math.tanh %122 : vector<8x32xf32>
    %124 = arith.mulf %117, %123 : vector<8x32xf32>
    %c2 = arith.constant 2 : index
    %c0_70 = arith.constant 0 : index
    %c0_71 = arith.constant 0 : index
    %125 = vector.load %arg3[%c2, %c0_70, %c0_71] : memref<5x8x7xf32, #tpu.memory_space<vmem>>, vector<1x8x7xf32>
    %126 = vector.shape_cast %125 : vector<1x8x7xf32> to vector<8x7xf32>
    %cst_72 = arith.constant dense<0.000000e+00> : vector<8x128xf32>
    %127 = tpu.matmul %126, %72, %cst_72 {dimension_numbers = #tpu.dot_dimension_numbers<[1], [0], [0], [1], [0, 0, 1, 1], [], []>} : vector<8x7xf32>, vector<7x128xf32>, vector<8x128xf32> -> vector<8x128xf32>
    %cst_73 = arith.constant dense<0.000000e+00> : vector<8x128xf32>
    %128 = tpu.matmul %124, %73, %cst_73 {dimension_numbers = #tpu.dot_dimension_numbers<[1], [0], [0], [1], [0, 0, 1, 1], [], []>} : vector<8x32xf32>, vector<32x128xf32>, vector<8x128xf32> -> vector<8x128xf32>
    %129 = arith.addf %127, %128 : vector<8x128xf32>
    %130 = vector.broadcast %74 : vector<1x128xf32> to vector<8x128xf32>
    %131 = arith.addf %129, %130 : vector<8x128xf32>
    %cst_74 = arith.constant 5.000000e-01 : f32
    %132 = vector.broadcast %cst_74 : f32 to vector<8x128xf32>
    %133 = arith.mulf %132, %131 : vector<8x128xf32>
    %134 = math.tanh %133 : vector<8x128xf32>
    %cst_75 = arith.constant 5.000000e-01 : f32
    %135 = vector.broadcast %cst_75 : f32 to vector<8x128xf32>
    %136 = arith.mulf %135, %134 : vector<8x128xf32>
    %cst_76 = arith.constant 5.000000e-01 : f32
    %137 = vector.broadcast %cst_76 : f32 to vector<8x128xf32>
    %138 = arith.addf %136, %137 : vector<8x128xf32>
    %139 = vector.extract_strided_slice %138 {offsets = [0, 0], sizes = [8, 32], strides = [1, 1]} : vector<8x128xf32> to vector<8x32xf32>
    %140 = vector.extract_strided_slice %138 {offsets = [0, 32], sizes = [8, 32], strides = [1, 1]} : vector<8x128xf32> to vector<8x32xf32>
    %141 = vector.extract_strided_slice %138 {offsets = [0, 96], sizes = [8, 32], strides = [1, 1]} : vector<8x128xf32> to vector<8x32xf32>
    %142 = vector.extract_strided_slice %131 {offsets = [0, 64], sizes = [8, 32], strides = [1, 1]} : vector<8x128xf32> to vector<8x32xf32>
    %143 = math.tanh %142 : vector<8x32xf32>
    %144 = arith.mulf %140, %122 : vector<8x32xf32>
    %145 = arith.mulf %139, %143 : vector<8x32xf32>
    %146 = arith.addf %144, %145 : vector<8x32xf32>
    %147 = math.tanh %146 : vector<8x32xf32>
    %148 = arith.mulf %141, %147 : vector<8x32xf32>
    %c3 = arith.constant 3 : index
    %c0_77 = arith.constant 0 : index
    %c0_78 = arith.constant 0 : index
    %149 = vector.load %arg3[%c3, %c0_77, %c0_78] : memref<5x8x7xf32, #tpu.memory_space<vmem>>, vector<1x8x7xf32>
    %150 = vector.shape_cast %149 : vector<1x8x7xf32> to vector<8x7xf32>
    %cst_79 = arith.constant dense<0.000000e+00> : vector<8x128xf32>
    %151 = tpu.matmul %150, %72, %cst_79 {dimension_numbers = #tpu.dot_dimension_numbers<[1], [0], [0], [1], [0, 0, 1, 1], [], []>} : vector<8x7xf32>, vector<7x128xf32>, vector<8x128xf32> -> vector<8x128xf32>
    %cst_80 = arith.constant dense<0.000000e+00> : vector<8x128xf32>
    %152 = tpu.matmul %148, %73, %cst_80 {dimension_numbers = #tpu.dot_dimension_numbers<[1], [0], [0], [1], [0, 0, 1, 1], [], []>} : vector<8x32xf32>, vector<32x128xf32>, vector<8x128xf32> -> vector<8x128xf32>
    %153 = arith.addf %151, %152 : vector<8x128xf32>
    %154 = vector.broadcast %74 : vector<1x128xf32> to vector<8x128xf32>
    %155 = arith.addf %153, %154 : vector<8x128xf32>
    %cst_81 = arith.constant 5.000000e-01 : f32
    %156 = vector.broadcast %cst_81 : f32 to vector<8x128xf32>
    %157 = arith.mulf %156, %155 : vector<8x128xf32>
    %158 = math.tanh %157 : vector<8x128xf32>
    %cst_82 = arith.constant 5.000000e-01 : f32
    %159 = vector.broadcast %cst_82 : f32 to vector<8x128xf32>
    %160 = arith.mulf %159, %158 : vector<8x128xf32>
    %cst_83 = arith.constant 5.000000e-01 : f32
    %161 = vector.broadcast %cst_83 : f32 to vector<8x128xf32>
    %162 = arith.addf %160, %161 : vector<8x128xf32>
    %163 = vector.extract_strided_slice %162 {offsets = [0, 0], sizes = [8, 32], strides = [1, 1]} : vector<8x128xf32> to vector<8x32xf32>
    %164 = vector.extract_strided_slice %162 {offsets = [0, 32], sizes = [8, 32], strides = [1, 1]} : vector<8x128xf32> to vector<8x32xf32>
    %165 = vector.extract_strided_slice %162 {offsets = [0, 96], sizes = [8, 32], strides = [1, 1]} : vector<8x128xf32> to vector<8x32xf32>
    %166 = vector.extract_strided_slice %155 {offsets = [0, 64], sizes = [8, 32], strides = [1, 1]} : vector<8x128xf32> to vector<8x32xf32>
    %167 = math.tanh %166 : vector<8x32xf32>
    %168 = arith.mulf %164, %146 : vector<8x32xf32>
    %169 = arith.mulf %163, %167 : vector<8x32xf32>
    %170 = arith.addf %168, %169 : vector<8x32xf32>
    %171 = math.tanh %170 : vector<8x32xf32>
    %172 = arith.mulf %165, %171 : vector<8x32xf32>
    %c4 = arith.constant 4 : index
    %c0_84 = arith.constant 0 : index
    %c0_85 = arith.constant 0 : index
    %173 = vector.load %arg3[%c4, %c0_84, %c0_85] : memref<5x8x7xf32, #tpu.memory_space<vmem>>, vector<1x8x7xf32>
    %174 = vector.shape_cast %173 : vector<1x8x7xf32> to vector<8x7xf32>
    %cst_86 = arith.constant dense<0.000000e+00> : vector<8x128xf32>
    %175 = tpu.matmul %174, %72, %cst_86 {dimension_numbers = #tpu.dot_dimension_numbers<[1], [0], [0], [1], [0, 0, 1, 1], [], []>} : vector<8x7xf32>, vector<7x128xf32>, vector<8x128xf32> -> vector<8x128xf32>
    %cst_87 = arith.constant dense<0.000000e+00> : vector<8x128xf32>
    %176 = tpu.matmul %172, %73, %cst_87 {dimension_numbers = #tpu.dot_dimension_numbers<[1], [0], [0], [1], [0, 0, 1, 1], [], []>} : vector<8x32xf32>, vector<32x128xf32>, vector<8x128xf32> -> vector<8x128xf32>
    %177 = arith.addf %175, %176 : vector<8x128xf32>
    %178 = vector.broadcast %74 : vector<1x128xf32> to vector<8x128xf32>
    %179 = arith.addf %177, %178 : vector<8x128xf32>
    %cst_88 = arith.constant 5.000000e-01 : f32
    %180 = vector.broadcast %cst_88 : f32 to vector<8x128xf32>
    %181 = arith.mulf %180, %179 : vector<8x128xf32>
    %182 = math.tanh %181 : vector<8x128xf32>
    %cst_89 = arith.constant 5.000000e-01 : f32
    %183 = vector.broadcast %cst_89 : f32 to vector<8x128xf32>
    %184 = arith.mulf %183, %182 : vector<8x128xf32>
    %cst_90 = arith.constant 5.000000e-01 : f32
    %185 = vector.broadcast %cst_90 : f32 to vector<8x128xf32>
    %186 = arith.addf %184, %185 : vector<8x128xf32>
    %187 = vector.extract_strided_slice %186 {offsets = [0, 0], sizes = [8, 32], strides = [1, 1]} : vector<8x128xf32> to vector<8x32xf32>
    %188 = vector.extract_strided_slice %186 {offsets = [0, 32], sizes = [8, 32], strides = [1, 1]} : vector<8x128xf32> to vector<8x32xf32>
    %189 = vector.extract_strided_slice %186 {offsets = [0, 96], sizes = [8, 32], strides = [1, 1]} : vector<8x128xf32> to vector<8x32xf32>
    %190 = vector.extract_strided_slice %179 {offsets = [0, 64], sizes = [8, 32], strides = [1, 1]} : vector<8x128xf32> to vector<8x32xf32>
    %191 = math.tanh %190 : vector<8x32xf32>
    %192 = arith.mulf %188, %170 : vector<8x32xf32>
    %193 = arith.mulf %187, %191 : vector<8x32xf32>
    %194 = arith.addf %192, %193 : vector<8x32xf32>
    %195 = math.tanh %194 : vector<8x32xf32>
    %196 = arith.mulf %189, %195 : vector<8x32xf32>
    %c320_91 = arith.constant 320 : index
    %c0_92 = arith.constant 0 : index
    %197 = vector.load %arg6[%c320_91, %c0_92] : memref<368x128xf32, #tpu.memory_space<vmem>>, vector<6x64xf32>
    %cst_93 = arith.constant dense<0.000000e+00> : vector<8x64xf32>
    %198 = tpu.matmul %1, %197, %cst_93 {dimension_numbers = #tpu.dot_dimension_numbers<[1], [0], [0], [1], [0, 0, 1, 1], [], []>} : vector<8x6xf32>, vector<6x64xf32>, vector<8x64xf32> -> vector<8x64xf32>
    %c240 = arith.constant 240 : index
    %c0_94 = arith.constant 0 : index
    %199 = vector.load %arg6[%c240, %c0_94] : memref<368x128xf32, #tpu.memory_space<vmem>>, vector<32x64xf32>
    %cst_95 = arith.constant dense<0.000000e+00> : vector<8x64xf32>
    %200 = tpu.matmul %196, %199, %cst_95 {dimension_numbers = #tpu.dot_dimension_numbers<[1], [0], [0], [1], [0, 0, 1, 1], [], []>} : vector<8x32xf32>, vector<32x64xf32>, vector<8x64xf32> -> vector<8x64xf32>
    %201 = arith.addf %198, %200 : vector<8x64xf32>
    %c352 = arith.constant 352 : index
    %c0_96 = arith.constant 0 : index
    %202 = vector.load %arg6[%c352, %c0_96] : memref<368x128xf32, #tpu.memory_space<vmem>>, vector<1x64xf32>
    %203 = vector.broadcast %202 : vector<1x64xf32> to vector<8x64xf32>
    %204 = arith.addf %201, %203 : vector<8x64xf32>
    %cst_97 = arith.constant 0.000000e+00 : f32
    %205 = vector.broadcast %cst_97 : f32 to vector<8x64xf32>
    %206 = arith.maximumf %204, %205 : vector<8x64xf32>
    %c112_98 = arith.constant 112 : index
    %c0_99 = arith.constant 0 : index
    %207 = vector.load %arg6[%c112_98, %c0_99] : memref<368x128xf32, #tpu.memory_space<vmem>>, vector<64x32xf32>
    %cst_100 = arith.constant dense<0.000000e+00> : vector<8x32xf32>
    %208 = tpu.matmul %206, %207, %cst_100 {dimension_numbers = #tpu.dot_dimension_numbers<[1], [0], [0], [1], [0, 0, 1, 1], [], []>} : vector<8x64xf32>, vector<64x32xf32>, vector<8x32xf32> -> vector<8x32xf32>
    %c352_101 = arith.constant 352 : index
    %c64_102 = arith.constant 64 : index
    %209 = vector.load %arg6[%c352_101, %c64_102] : memref<368x128xf32, #tpu.memory_space<vmem>>, vector<1x32xf32>
    %210 = vector.broadcast %209 : vector<1x32xf32> to vector<8x32xf32>
    %211 = arith.addf %208, %210 : vector<8x32xf32>
    %c240_103 = arith.constant 240 : index
    %c64_104 = arith.constant 64 : index
    %212 = vector.load %arg6[%c240_103, %c64_104] : memref<368x128xf32, #tpu.memory_space<vmem>>, vector<32x32xf32>
    %cst_105 = arith.constant dense<0.000000e+00> : vector<8x32xf32>
    %213 = tpu.matmul %211, %212, %cst_105 {dimension_numbers = #tpu.dot_dimension_numbers<[1], [0], [0], [1], [0, 0, 1, 1], [], []>} : vector<8x32xf32>, vector<32x32xf32>, vector<8x32xf32> -> vector<8x32xf32>
    %c272 = arith.constant 272 : index
    %c0_106 = arith.constant 0 : index
    %214 = vector.load %arg6[%c272, %c0_106] : memref<368x128xf32, #tpu.memory_space<vmem>>, vector<32x32xf32>
    %cst_107 = arith.constant dense<0.000000e+00> : vector<8x32xf32>
    %215 = tpu.matmul %71, %214, %cst_107 {dimension_numbers = #tpu.dot_dimension_numbers<[1], [0], [0], [1], [0, 0, 1, 1], [], []>} : vector<8x32xf32>, vector<32x32xf32>, vector<8x32xf32> -> vector<8x32xf32>
    %216 = arith.addf %213, %215 : vector<8x32xf32>
    %c360 = arith.constant 360 : index
    %c0_108 = arith.constant 0 : index
    %217 = vector.load %arg6[%c360, %c0_108] : memref<368x128xf32, #tpu.memory_space<vmem>>, vector<1x32xf32>
    %218 = vector.broadcast %217 : vector<1x32xf32> to vector<8x32xf32>
    %219 = arith.addf %216, %218 : vector<8x32xf32>
    %cst_109 = arith.constant 0.000000e+00 : f32
    %220 = vector.broadcast %cst_109 : f32 to vector<8x32xf32>
    %221 = arith.maximumf %219, %220 : vector<8x32xf32>
    %c272_110 = arith.constant 272 : index
    %c64_111 = arith.constant 64 : index
    %222 = vector.load %arg6[%c272_110, %c64_111] : memref<368x128xf32, #tpu.memory_space<vmem>>, vector<32x1xf32>
    %cst_112 = arith.constant dense<0.000000e+00> : vector<8x1xf32>
    %223 = tpu.matmul %221, %222, %cst_112 {dimension_numbers = #tpu.dot_dimension_numbers<[1], [0], [0], [1], [0, 0, 1, 1], [], []>} : vector<8x32xf32>, vector<32x1xf32>, vector<8x1xf32> -> vector<8x1xf32>
    %c360_113 = arith.constant 360 : index
    %c64_114 = arith.constant 64 : index
    %224 = vector.load %arg6[%c360_113, %c64_114] : memref<368x128xf32, #tpu.memory_space<vmem>>, vector<1x1xf32>
    %225 = vector.broadcast %224 : vector<1x1xf32> to vector<8x1xf32>
    %226 = arith.addf %223, %225 : vector<8x1xf32>
    %c0_115 = arith.constant 0 : index
    %c0_116 = arith.constant 0 : index
    %227 = vector.load %arg7[%c0_115, %c0_116] : memref<8x1xf32, #tpu.memory_space<vmem>>, vector<8x1xf32>
    tpu.vector_store %arg7[%c0_115, %c0_116], %226 {strides = array<i32>} : memref<8x1xf32, #tpu.memory_space<vmem>>, vector<8x1xf32>,
    return
  }
  func.func @transform_0(%arg0: i32) -> (i32, i32) {
    %c0_i32 = arith.constant 0 : i32
    %c0_i32_0 = arith.constant 0 : i32
    return %arg0, %c0_i32 : i32, i32
  }
  func.func @transform_1(%arg0: i32) -> (i32, i32) {
    %c0_i32 = arith.constant 0 : i32
    %c0_i32_0 = arith.constant 0 : i32
    return %arg0, %c0_i32 : i32, i32
  }
  func.func @transform_2(%arg0: i32) -> (i32, i32, i32) {
    %c0_i32 = arith.constant 0 : i32
    %c0_i32_0 = arith.constant 0 : i32
    %c0_i32_1 = arith.constant 0 : i32
    return %c0_i32, %arg0, %c0_i32_0 : i32, i32, i32
  }
  func.func @transform_3(%arg0: i32) -> (i32, i32) {
    %c0_i32 = arith.constant 0 : i32
    %c0_i32_0 = arith.constant 0 : i32
    %c0_i32_1 = arith.constant 0 : i32
    return %c0_i32, %c0_i32_0 : i32, i32
  }
  func.func @transform_4(%arg0: i32) -> (i32, i32) {
    %c0_i32 = arith.constant 0 : i32
    %c0_i32_0 = arith.constant 0 : i32
    %c0_i32_1 = arith.constant 0 : i32
    return %c0_i32, %c0_i32_0 : i32, i32
  }
  func.func @transform_5(%arg0: i32) -> (i32, i32) {
    %c0_i32 = arith.constant 0 : i32
    %c0_i32_0 = arith.constant 0 : i32
    %c0_i32_1 = arith.constant 0 : i32
    return %c0_i32, %c0_i32_0 : i32, i32
  }
  func.func @transform_6(%arg0: i32) -> (i32, i32) {
    %c0_i32 = arith.constant 0 : i32
    %c0_i32_0 = arith.constant 0 : i32
    return %arg0, %c0_i32 : i32, i32
  }
}

</mosaic_0001>

<bundles_post_ra>
// kernel: value_network.1
= control target key start
LH: loop header
LB: loop body
LE: loop exit
PB: predicated region body
PF: predicated region fallthrough
CT: control target
= control target key end

     0   :  { %11 = vsyncpa [#allocation3], 0  ;;  %s3502_s21 = smov [#allocation2]   ;;  %s4083_s0 = inlined_call_operand.vmem [shape: f32[40,13], index: 0, kind: input, shape index: {}]   ;;  %s4084_s1 = inlined_call_operand.vmem [shape: f32[8,6], index: 1, kind: input, shape index: {}]   ;;  %s4085_s2 = inlined_call_operand.vmem [shape: f32[5,8,7], index: 2, kind: input, shape index: {}]   ;;  %s4086_s3 = inlined_call_operand.vmem [shape: f32[8,40], index: 3, kind: input, shape index: {}]   ;;  %s4087_s4 = inlined_call_operand.vmem [shape: f32[40,8], index: 4, kind: input, shape index: {}]   ;;  %s4088_s5 = inlined_call_operand.hbm [shape: f32[368,128], index: 5, kind: input, shape index: {}]   ;;  %s4089_s6 = inlined_call_operand.vmem [shape: f32[8,1], index: 6, kind: output, shape index: {}]  }
   0x1   :  { %s27_s22 = sshll.u32 %s3502_s21, 4  ;;  %s28_s22 = int_to_ptr.vmem [resolvable:$true] %s27_s22 }
   0x2   :  { %s3488_s23 = scalar_lea.vmem %s28_s22, 5888  ;;  %p3493_p1 = scmp.lt.s32.totalorder %s28_s22, %s28_s22 }
   0x3   :  { %p3489_p0 = scmp.ne.s32.totalorder %s28_s22, %s3488_s23  ;;  %p3494_p2 = scmp.lt.s32.totalorder %s3488_s23, %s3488_s23 }
   0x5   :  { %p3495_p3 = por %p3494_p2, %p3493_p1 }
   0x7   :  { %p3496_p4 = pnand %p3495_p3, %p3489_p0 }
   0x9   :  { %3499 = shalt.err (!%p3496_p4)
}
   0xa   :  { %s3503_s24 = smov 128   ;;  %s3504_s25 = smov 8  }
   0xb   :  { %33 = dma.hbm_to_vmem [thread:$0]  %s4088_s5, 5888, %s28_s22, [#allocation3], %s3503_s24, %s3503_s24, %s3504_s25  }
   0xc   :  { %3500 = dma.done.wait [#allocation3], 5888  }
   0xd   :  { %3501 = vsyncadd [#allocation3], 4294961408  ;;  %v3505_v0 = vmov 0.0   ;;  %vm3506_vm0 = vmmov 0   ;;  %vm76_vm1 = vcmask 1044480   ;;  %v49_v2 = vld [vmem:[#allocation2 + $0x130] sm:$0xff] }
   0xe   :  { %3059 = vmatprep.subr.mxu0 %v3505_v0  ;;  %3063 = vmatprep.mubr.msk.f32.mxu0 %vm3506_vm0, %v3505_v0  ;;  %v50_v1 = vld [vmem:[#allocation2 + $0x138] sm:$0x1f]  ;;  %v37_v3 = vld [vmem:[%s4083_s0] sm:$0xff]  ;;  %vm60_vm2 = vcmask 105472   ;;  %v3558_v5 = vld [vmem:[#allocation2 + $0x68] sm:$0xff]  ;;  %s3507_s29 = smov 64  }
   0xf   :  { %3078 = vmatprep.subr.mxu1 %v3505_v0  ;;  %3094 = vmatprep.mubr.msk.f32.mxu1 %vm3506_vm0, %v3505_v0  ;;  %v2830_v4 = vld [vmem:[#allocation2 + $0x140] ss:$0 sm:$0xff]  ;;  %v38_v7 = vld [vmem:[%s4083_s0 + $0x8] sm:$0xff]  ;;  %v3571_v8 = vld [vmem:[#allocation2 + $0x58] sm:$0xff]  ;;  %vm188_vm3 = vcmask 523264   ;;  %vm378_vm4 = vcmask 261120  }
  0x10   :  { %3060 = vmatpush3.msk.msra.mxu0 %vm76_vm1, %v50_v1  ;;  %57 = vrot.lane.b32.xlu0 %v2830_v4, %s3507_s29  ;;  %v3561_v6 = vld [vmem:[#allocation2 + $0x60] sm:$0xff]  ;;  %v3576_v9 = vld [vmem:[#allocation2 + $0x50] sm:$0xff]  ;;  %v3586_v11 = vld [vmem:[#allocation2 + $0x48] sm:$0xff]  ;;  %vm299_vm5 = vcmask 326656   ;;  %vm452_vm6 = vcmask 64512   ;;  %vm941_vm7 = vcmask 7168  }
  0x11   :  { %3061 = vmatprep.subr.mxu0 %v3505_v0  ;;  %3079 = vmatpush3.msra.mxu1 %v3558_v5  ;;  %v39_v10 = vld [vmem:[%s4083_s0 + $0x10] sm:$0xff]  ;;  %v3590_v12 = vld [vmem:[#allocation2 + $0x40] sm:$0xff]  ;;  %v40_v13 = vld [vmem:[%s4083_s0 + $0x18] sm:$0xff]  ;;  %vm1247_vm8 = vcmask 1045504   ;;  %vm1243_vm9 = vcmask 48128   ;;  %vm1520_vm10 = vcmask 1046528  }
  0x12   :  { %3062 = vmatpush3.msra.mxu0 %v49_v2  ;;  %3080 = vmatprep.subr.mxu1 %v3505_v0  ;;  %v41_v14 = vld [vmem:[%s4083_s0 + $0x20] sm:$0xff]  ;;  %v3611_v15 = vld [vmem:[#allocation2 + $0x38] sm:$0xff]  ;;  %v3615_v16 = vld [vmem:[#allocation2 + $0x30] sm:$0xff]  ;;  %vm1516_vm11 = vcmask 56320   ;;  %s3509_s26 = smov 32  }
  0x13   :  { %3064 = vmatmul.mubr.msk.f32.vlgmr.msra.gmra.mxu0 %vm60_vm2, %v37_v3  ;;  %3081 = vmatpush3.msra.mxu1 %v3561_v6  ;;  %v560_v17 = vld [vmem:[#allocation2 + $0x80] sm:$0xff]  ;;  %v561_v18 = vld [vmem:[#allocation2 + $0x88] sm:$0xff]  ;;  %v559_v19 = vld [vmem:[#allocation2 + $0x78] sm:$0xff] }
  0x14   :  { %3066 = vmatprep.mubr.msk.f32.mxu0 %vm3506_vm0, %v3505_v0  ;;  %3109 = vmatprep.subr.mxu0 %v3505_v0  ;;  %v558_v20 = vld [vmem:[#allocation2 + $0x70] sm:$0xff]  ;;  %v2837_v46 = vld [vmem:[#allocation2 + $0x148] ss:$0 sm:$0xff]  ;;  %v3682_v4 = vld [vmem:[%s4086_s3] sm:$0xff] }
  0x15   :  { %3082 = vmatprep.subr.mxu1 %v3505_v0  ;;  %570 = vrot.lane.b32.xlu1 %v560_v17, %s3507_s29 }
  0x16   :  { %3083 = vmatpush3.msra.mxu1 %v3571_v8  ;;  %572 = vrot.lane.b32.xlu0 %v561_v18, %s3507_s29 }
  0x17   :  { %3067 = vmatmul.mubr.msk.f32.gmra.mxu0 %vm60_vm2, %v38_v7  ;;  %3084 = vmatprep.subr.mxu1 %v3505_v0  ;;  %v377_v7 = vld [vmem:[#allocation2 + $0xc8] sm:$0xff] }
  0x18   :  { %3069 = vmatprep.mubr.msk.f32.mxu0 %vm3506_vm0, %v3505_v0  ;;  %3085 = vmatpush3.msra.mxu1 %v3576_v9 }
  0x19   :  { %3086 = vmatprep.subr.mxu1 %v3505_v0  ;;  %568 = vrot.lane.b32.xlu1 %v559_v19, %s3507_s29 }
  0x1a   :  { %3087 = vmatpush3.msra.mxu1 %v3586_v11  ;;  %566 = vrot.lane.b32.xlu0 %v558_v20, %s3507_s29 }
  0x1b   :  { %3070 = vmatmul.mubr.msk.f32.gmra.mxu0 %vm60_vm2, %v39_v10  ;;  %3088 = vmatprep.subr.mxu1 %v3505_v0  ;;  %v376_v10 = vld [vmem:[#allocation2 + $0xc0] sm:$0xff] }
  0x1c   :  { %3072 = vmatprep.mubr.msk.f32.mxu0 %vm3506_vm0, %v3505_v0  ;;  %3089 = vmatpush3.msra.mxu1 %v3590_v12 }
  0x1d   :  { %3090 = vmatprep.subr.mxu1 %v3505_v0  ;;  %712 = vrot.lane.b32.xlu1 %v377_v7, %s3507_s29 }
  0x1e   :  { %3091 = vmatpush3.msra.mxu1 %v3611_v15  ;;  %710 = vrot.lane.b32.xlu0 %v376_v10, %s3507_s29 }
  0x1f   :  { %3073 = vmatmul.mubr.msk.f32.gmra.mxu0 %vm60_vm2, %v40_v13  ;;  %3092 = vmatprep.subr.mxu1 %v3505_v0  ;;  %v375_v13 = vld [vmem:[#allocation2 + $0xb8] sm:$0xff] }
  0x20   :  { %3075 = vmatprep.mubr.msk.f32.mxu0 %vm3506_vm0, %v3505_v0  ;;  %3093 = vmatpush3.msra.mxu1 %v3615_v16 }
  0x21   :  { %3150 = vmatprep.subr.mxu1 %v3505_v0  ;;  %684 = vrot.lane.b32.xlu1 %v2837_v46, %s3507_s29 }
  0x22   :  { %708 = vrot.lane.b32.xlu0 %v375_v13, %s3507_s29 }
  0x23   :  { %3076 = vmatmul.mubr.msk.f32.gmra.mxu0 %vm60_vm2, %v41_v14  ;;  %v374_v14 = vld [vmem:[#allocation2 + $0xb0] sm:$0xff] }
  0x24   :  { %3119 = vmatprep.mubr.msk.f32.mxu0 %vm3506_vm0, %v3505_v0 }
  0x25   :  { %706 = vrot.lane.b32.xlu1 %v374_v14, %s3507_s29 }
  0x82   :  { %v58_v21 = vpop.permute.xlu0 %57 }
  0x87   :  { %v571_v35 = vpop.permute.xlu1 %570 }
  0x88   :  { %v573_v32 = vpop.permute.xlu0 %572 }
  0x8b   :  { %v569_v44 = vpop.permute.xlu1 %568 }
  0x8c   :  { %v567_v45 = vpop.permute.xlu0 %566 }
  0xd3   :  { %v146_v22 = vpop.f32.mrf.mxu0 }
  0xd4   :  { %v147_v23 = vadd.f32 %v146_v22, %v58_v21 }
  0xd5   :  { %v3065_v24 = vpop.f32.mrf.mxu0 }
  0xd6   :  { %v170_v25 = vmax.f32 %v147_v23, 0.0 }
  0xd7   :  { %v151_v26 = vpop.f32.mrf.mxu0 }
  0xd8   :  { %v152_v27 = vadd.f32 %v151_v26, %v58_v21  ;;  %3095 = vmatmul.mubr.msk.f32.vlgmr.msra.gmra.mxu1 %vm188_vm3, %v170_v25 }
  0xd9   :  { %v3068_v28 = vpop.f32.mrf.mxu0  ;;  %3097 = vmatprep.mubr.msk.f32.mxu1 %vm3506_vm0, %v3505_v0  ;;  %3151 = vmatpush3.msra.mxu1 %v573_v32  ;;  %v713_v32 = vpop.permute.xlu1 %712 }
  0xda   :  { %v171_v29 = vmax.f32 %v152_v27, 0.0  ;;  %3152 = vmatprep.subr.mxu1 %v3505_v0 }
  0xdb   :  { %v156_v30 = vpop.f32.mrf.mxu0  ;;  %3153 = vmatpush3.msra.mxu1 %v571_v35  ;;  %v45_v35 = vld [vmem:[%s4087_s4 + $0x8] sm:$0xff] }
  0xdc   :  { %v157_v31 = vadd.f32 %v156_v30, %v58_v21  ;;  %3098 = vmatmul.mubr.msk.f32.gmra.mxu1 %vm188_vm3, %v171_v29  ;;  %3154 = vmatprep.subr.mxu1 %v3505_v0  ;;  %v44_v30 = vld [vmem:[%s4087_s4] sm:$0xff] }
  0xdd   :  { %v3071_v33 = vpop.f32.mrf.mxu0  ;;  %3100 = vmatprep.mubr.msk.f32.mxu1 %vm3506_vm0, %v3505_v0  ;;  %3155 = vmatpush3.msra.mxu1 %v569_v44 }
  0xde   :  { %v172_v34 = vmax.f32 %v157_v31, 0.0  ;;  %3156 = vmatprep.subr.mxu1 %v3505_v0 }
  0xdf   :  { %v161_v36 = vpop.f32.mrf.mxu0  ;;  %3157 = vmatpush3.msra.mxu1 %v567_v45 }
  0xe0   :  { %v162_v37 = vadd.f32 %v161_v36, %v58_v21  ;;  %3101 = vmatmul.mubr.msk.f32.gmra.mxu1 %vm188_vm3, %v172_v34  ;;  %3196 = vmatprep.subr.mxu1 %v3505_v0  ;;  %v711_v34 = vpop.permute.xlu0 %710  ;;  %v46_v36 = vld [vmem:[%s4087_s4 + $0x10] sm:$0xff] }
  0xe1   :  { %v3074_v38 = vpop.f32.mrf.mxu0  ;;  %3103 = vmatprep.mubr.msk.f32.mxu1 %vm3506_vm0, %v3505_v0 }
  0xe2   :  { %v173_v39 = vmax.f32 %v162_v37, 0.0  ;;  %v47_v37 = vld [vmem:[%s4087_s4 + $0x18] sm:$0xff]  ;;  %v48_v38 = vld [vmem:[%s4087_s4 + $0x20] sm:$0xff] }
  0xe3   :  { %v166_v40 = vpop.f32.mrf.mxu0 }
  0xe4   :  { %v167_v41 = vadd.f32 %v166_v40, %v58_v21  ;;  %3104 = vmatmul.mubr.msk.f32.gmra.mxu1 %vm188_vm3, %v173_v39  ;;  %v685_v39 = vpop.permute.xlu1 %684  ;;  %v709_v40 = vpop.permute.xlu0 %708 }
  0xe5   :  { %v3077_v42 = vpop.f32.mrf.mxu0  ;;  %3106 = vmatprep.mubr.msk.f32.mxu1 %vm3506_vm0, %v3505_v0 }
  0xe6   :  { %v174_v43 = vmax.f32 %v167_v41, 0.0  ;;  %v3742_v42 = vld [vmem:[#allocation2 + $0xe8] sm:$0xff] }
  0xe8   :  { %3107 = vmatmul.mubr.msk.f32.gmra.mxu1 %vm188_vm3, %v174_v43  ;;  %v707_v41 = vpop.permute.xlu1 %706  ;;  %v3744_v43 = vld [vmem:[#allocation2 + $0x150] ss:$0 sm:$0xff] }
  0xe9   :  { %3158 = vmatprep.mubr.msk.f32.mxu1 %vm3506_vm0, %v3505_v0  ;;  %833 = vrot.lane.b32.xlu0 %v3744_v43, %s3507_s29 }
 0x198   :  { %v270_v47 = vpop.f32.mrf.mxu1 }
 0x199   :  { %v271_v48 = vadd.f32 %v2837_v46, %v270_v47 }
 0x19a   :  { %v3096_v49 = vpop.f32.mrf.mxu1 }
 0x19b   :  { %v3642_v50 = vmax.f32 %v271_v48, 0.0 }
 0x19c   :  { %v275_v51 = vpop.f32.mrf.mxu1 }
 0x19d   :  { %v276_v52 = vadd.f32 %v2837_v46, %v275_v51  ;;  %3159 = vmatmul.mubr.msk.f32.vlgmr.msra.gmra.mxu1 %vm378_vm4, %v3642_v50 }
 0x19e   :  { %v3099_v53 = vpop.f32.mrf.mxu1  ;;  %3161 = vmatprep.mubr.msk.f32.mxu1 %vm3506_vm0, %v3505_v0  ;;  %3197 = vmatpush3.msra.mxu1 %v3742_v42 }
 0x19f   :  { %v3648_v54 = vmax.f32 %v276_v52, 0.0  ;;  %3198 = vmatprep.subr.mxu1 %v3505_v0 }
 0x1a0   :  { %v280_v55 = vpop.f32.mrf.mxu1 }
 0x1a1   :  { %v281_v56 = vadd.f32 %v2837_v46, %v280_v55  ;;  %3162 = vmatmul.mubr.msk.f32.gmra.mxu1 %vm378_vm4, %v3648_v54 }
 0x1a2   :  { %v3102_v57 = vpop.f32.mrf.mxu1  ;;  %3164 = vmatprep.mubr.msk.f32.mxu1 %vm3506_vm0, %v3505_v0 }
 0x1a3   :  { %v3654_v58 = vmax.f32 %v281_v56, 0.0 }
 0x1a4   :  { %v285_v59 = vpop.f32.mrf.mxu1 }
 0x1a5   :  { %v286_v60 = vadd.f32 %v2837_v46, %v285_v59  ;;  %3165 = vmatmul.mubr.msk.f32.gmra.mxu1 %vm378_vm4, %v3654_v58 }
 0x1a6   :  { %v3105_v61 = vpop.f32.mrf.mxu1  ;;  %3167 = vmatprep.mubr.msk.f32.mxu1 %vm3506_vm0, %v3505_v0 }
 0x1a7   :  { %v3660_v62 = vmax.f32 %v286_v60, 0.0 }
 0x1a8   :  { %v290_v63 = vpop.f32.mrf.mxu1 }
 0x1a9   :  { %v291_v1 = vadd.f32 %v2837_v46, %v290_v63  ;;  %3168 = vmatmul.mubr.msk.f32.gmra.mxu1 %vm378_vm4, %v3660_v62 }
 0x1aa   :  { %v3108_v2 = vpop.f32.mrf.mxu1  ;;  %3170 = vmatprep.mubr.msk.f32.mxu1 %vm3506_vm0, %v3505_v0 }
 0x1ab   :  { %v3666_v3 = vmax.f32 %v291_v1, 0.0 }
 0x1ad   :  { %3110 = vmatpush3.msra.mxu0 %v3666_v3  ;;  %3171 = vmatmul.mubr.msk.f32.gmra.mxu1 %vm378_vm4, %v3666_v3 }
 0x1ae   :  { %3111 = vmatprep.subr.mxu0 %v3505_v0  ;;  %3204 = vmatprep.mubr.msk.f32.mxu1 %vm3506_vm0, %v3505_v0 }
 0x1af   :  { %3112 = vmatpush3.msra.mxu0 %v3660_v62 }
 0x1b0   :  { %3113 = vmatprep.subr.mxu0 %v3505_v0 }
 0x1b1   :  { %3114 = vmatpush3.msra.mxu0 %v3654_v58 }
 0x1b2   :  { %3115 = vmatprep.subr.mxu0 %v3505_v0 }
 0x1b3   :  { %3116 = vmatpush3.msra.mxu0 %v3648_v54 }
 0x1b4   :  { %3117 = vmatprep.subr.mxu0 %v3505_v0 }
 0x1b5   :  { %3118 = vmatpush3.msra.mxu0 %v3642_v50 }
 0x1b6   :  { %3120 = vmatmul.mubr.msk.f32.vlgmr.msra.gmra.mxu0 %vm299_vm5, %v3682_v4  ;;  %3122 = vmatprep.subr.mxu0 %v3505_v0 }
 0x1b7   :  { %3130 = vmatprep.mubr.msk.f32.mxu0 %vm3506_vm0, %v3505_v0  ;;  %3123 = vmatpush3.msra.mxu0 %v377_v7 }
 0x1b8   :  { %3124 = vmatprep.subr.mxu0 %v3505_v0 }
 0x1b9   :  { %3125 = vmatpush3.msra.mxu0 %v376_v10 }
 0x1ba   :  { %3126 = vmatprep.subr.mxu0 %v3505_v0 }
 0x1bb   :  { %3127 = vmatpush3.msra.mxu0 %v375_v13 }
 0x1bc   :  { %3128 = vmatprep.subr.mxu0 %v3505_v0 }
 0x1bd   :  { %3129 = vmatpush3.msra.mxu0 %v374_v14 }
 0x1be   :  { %3133 = vmatprep.subr.mxu0 %v3505_v0 }
 0x25d   :  { %v659_v17 = vpop.f32.mrf.mxu1 }
 0x25f   :  { %v3160_v18 = vpop.f32.mrf.mxu1 }
 0x261   :  { %v664_v19 = vpop.f32.mrf.mxu1 }
 0x263   :  { %v3163_v20 = vpop.f32.mrf.mxu1 }
 0x264   :  { %v3767_v20 = vld [vmem:[#allocation2 + $0xe0] sm:$0xff] }
 0x265   :  { %v669_v21 = vpop.f32.mrf.mxu1  ;;  %3199 = vmatpush3.msra.mxu1 %v3767_v20 }
 0x266   :  { %3200 = vmatprep.subr.mxu1 %v3505_v0 }
 0x267   :  { %v3166_v22 = vpop.f32.mrf.mxu1 }
 0x268   :  { %v3775_v22 = vld [vmem:[#allocation2 + $0xd0] sm:$0xff] }
 0x269   :  { %v3700_v23 = vpop.f32.mrf.mxu1 }
 0x26b   :  { %v3169_v24 = vpop.f32.mrf.mxu1 }
 0x26d   :  { %v3702_v25 = vpop.f32.mrf.mxu1 }
 0x26f   :  { %v3172_v26 = vpop.f32.mrf.mxu1 }
 0x276   :  { %v369_v27 = vpop.f32.mrf.mxu0 }
 0x277   :  { %v373_v28 = vmul.f32 0.2, %v369_v27 }
 0x278   :  { %v3121_v29 = vpop.f32.mrf.mxu0 }
 0x279   :  { %3131 = vmatmul.mubr.msk.f32.vlgmr.msra.gmra.mxu0 %vm378_vm4, %v373_v28 }
 0x27a   :  { %3135 = vmatprep.mubr.msk.f32.mxu0 %vm3506_vm0, %v3505_v0 }
 0x339   :  { %v448_v31 = vpop.f32.mrf.mxu0 }
 0x33a   :  { %3134 = vmatpush3.msra.mxu0 %v448_v31 }
 0x33b   :  { %v3132_v33 = vpop.f32.mrf.mxu0  ;;  %3136 = vmatmul.mubr.msk.f32.vlgmr.msra.gmra.mxu0 %vm452_vm6, %v44_v30  ;;  %3173 = vmatprep.subr.mxu0 %v3505_v0 }
 0x33c   :  { %3138 = vmatprep.mubr.msk.f32.mxu0 %vm3506_vm0, %v3505_v0  ;;  %3174 = vmatpush3.msra.mxu0 %v713_v32 }
 0x33d   :  { %3175 = vmatprep.subr.mxu0 %v3505_v0 }
 0x33e   :  { %3176 = vmatpush3.msra.mxu0 %v711_v34 }
 0x33f   :  { %3139 = vmatmul.mubr.msk.f32.gmra.mxu0 %vm452_vm6, %v45_v35  ;;  %3177 = vmatprep.subr.mxu0 %v3505_v0 }
 0x340   :  { %3141 = vmatprep.mubr.msk.f32.mxu0 %vm3506_vm0, %v3505_v0  ;;  %3178 = vmatpush3.msra.mxu0 %v709_v40 }
 0x341   :  { %3179 = vmatprep.subr.mxu0 %v3505_v0 }
 0x342   :  { %3180 = vmatpush3.msra.mxu0 %v707_v41 }
 0x343   :  { %3142 = vmatmul.mubr.msk.f32.gmra.mxu0 %vm452_vm6, %v46_v36  ;;  %3219 = vmatprep.subr.mxu0 %v3505_v0 }
 0x344   :  { %3144 = vmatprep.mubr.msk.f32.mxu0 %vm3506_vm0, %v3505_v0 }
 0x347   :  { %3145 = vmatmul.mubr.msk.f32.gmra.mxu0 %vm452_vm6, %v47_v37 }
 0x348   :  { %3147 = vmatprep.mubr.msk.f32.mxu0 %vm3506_vm0, %v3505_v0 }
 0x34b   :  { %3148 = vmatmul.mubr.msk.f32.gmra.mxu0 %vm452_vm6, %v48_v38 }
 0x34c   :  { %3181 = vmatprep.mubr.msk.f32.mxu0 %vm3506_vm0, %v3505_v0 }
 0x3fb   :  { %v534_v44 = vpop.f32.mrf.mxu0 }
 0x3fc   :  { %v660_v45 = vadd.f32 %v659_v17, %v534_v44 }
 0x3fd   :  { %v3137_v46 = vpop.f32.mrf.mxu0 }
 0x3fe   :  { %v687_v47 = vadd.f32 %v685_v39, %v660_v45  ;;  %v3508_v45 = vmov 0  }
 0x3ff   :  { %v539_v48 = vpop.f32.mrf.mxu0  ;;  %3437 = vset.pattern.permute.xlu0 %v3508_v45  ;;  %3436 = vset.pattern.permute.xlu1 %v3508_v45 }
 0x400   :  { %v692_v49 = vmax.f32 %v687_v47, 0.0  ;;  %v665_v51 = vadd.f32 %v664_v19, %v539_v48 }
 0x401   :  { %v3140_v52 = vpop.f32.mrf.mxu0 }
 0x402   :  { %v688_v53 = vadd.f32 %v685_v39, %v665_v51  ;;  %3182 = vmatmul.mubr.msk.f32.vlgmr.msra.gmra.mxu0 %vm378_vm4, %v692_v49  ;;  %v834_v52 = vpop.permute.xlu0 %833 }
 0x403   :  { %v544_v55 = vpop.f32.mrf.mxu0  ;;  %3184 = vmatprep.mubr.msk.f32.mxu0 %vm3506_vm0, %v3505_v0 }
 0x404   :  { %v693_v56 = vmax.f32 %v688_v53, 0.0  ;;  %v670_v57 = vadd.f32 %v669_v21, %v544_v55  ;;  %v3771_v21 = vld [vmem:[#allocation2 + $0xd8] sm:$0xff] }
 0x405   :  { %v3143_v59 = vpop.f32.mrf.mxu0  ;;  %3201 = vmatpush3.msra.mxu1 %v3771_v21 }
 0x406   :  { %v689_v60 = vadd.f32 %v685_v39, %v670_v57  ;;  %3185 = vmatmul.mubr.msk.f32.gmra.mxu0 %vm378_vm4, %v693_v56  ;;  %3202 = vmatprep.subr.mxu1 %v3505_v0 }
 0x407   :  { %v549_v61 = vpop.f32.mrf.mxu0  ;;  %3187 = vmatprep.mubr.msk.f32.mxu0 %vm3506_vm0, %v3505_v0  ;;  %3203 = vmatpush3.msra.mxu1 %v3775_v22 }
 0x408   :  { %v694_v63 = vmax.f32 %v689_v60, 0.0  ;;  %v675_v1 = vadd.f32 %v3700_v23, %v549_v61  ;;  %3232 = vmatprep.subr.mxu1 %v3505_v0 }
 0x409   :  { %v3146_v2 = vpop.f32.mrf.mxu0 }
 0x40a   :  { %v690_v7 = vadd.f32 %v685_v39, %v675_v1  ;;  %3188 = vmatmul.mubr.msk.f32.gmra.mxu0 %vm378_vm4, %v694_v63 }
 0x40b   :  { %v554_v10 = vpop.f32.mrf.mxu0  ;;  %3190 = vmatprep.mubr.msk.f32.mxu0 %vm3506_vm0, %v3505_v0 }
 0x40c   :  { %v695_v13 = vmax.f32 %v690_v7, 0.0  ;;  %v680_v14 = vadd.f32 %v3702_v25, %v554_v10 }
 0x40d   :  { %v3149_v17 = vpop.f32.mrf.mxu0 }
 0x40e   :  { %v691_v18 = vadd.f32 %v685_v39, %v680_v14  ;;  %3191 = vmatmul.mubr.msk.f32.gmra.mxu0 %vm378_vm4, %v695_v13 }
 0x40f   :  { %3193 = vmatprep.mubr.msk.f32.mxu0 %vm3506_vm0, %v3505_v0 }
 0x410   :  { %v696_v19 = vmax.f32 %v691_v18, 0.0 }
 0x412   :  { %3194 = vmatmul.mubr.msk.f32.gmra.mxu0 %vm378_vm4, %v696_v19 }
 0x413   :  { %3229 = vmatprep.mubr.msk.f32.mxu0 %vm3506_vm0, %v3505_v0 }
 0x4c2   :  { %v799_v23 = vpop.f32.mrf.mxu0 }
 0x4c3   :  { %v800_v24 = vadd.f32 %v3744_v43, %v799_v23 }
 0x4c4   :  { %v3183_v25 = vpop.f32.mrf.mxu0 }
 0x4c5   :  { %v823_v26 = vmax.f32 %v800_v24, 0.0 }
 0x4c6   :  { %v804_v27 = vpop.f32.mrf.mxu0 }
 0x4c7   :  { %v805_v28 = vadd.f32 %v3744_v43, %v804_v27  ;;  %3205 = vmatmul.mubr.msk.f32.vlgmr.msra.gmra.mxu1 %vm378_vm4, %v823_v26 }
 0x4c8   :  { %v3186_v29 = vpop.f32.mrf.mxu0  ;;  %3207 = vmatprep.mubr.msk.f32.mxu1 %vm3506_vm0, %v3505_v0 }
 0x4c9   :  { %v824_v30 = vmax.f32 %v805_v28, 0.0 }
 0x4ca   :  { %v809_v31 = vpop.f32.mrf.mxu0 }
 0x4cb   :  { %v810_v32 = vadd.f32 %v3744_v43, %v809_v31  ;;  %3208 = vmatmul.mubr.msk.f32.gmra.mxu1 %vm378_vm4, %v824_v30 }
 0x4cc   :  { %v3189_v33 = vpop.f32.mrf.mxu0  ;;  %3210 = vmatprep.mubr.msk.f32.mxu1 %vm3506_vm0, %v3505_v0 }
 0x4cd   :  { %v825_v34 = vmax.f32 %v810_v32, 0.0 }
 0x4ce   :  { %v814_v35 = vpop.f32.mrf.mxu0 }
 0x4cf   :  { %v815_v36 = vadd.f32 %v3744_v43, %v814_v35  ;;  %3211 = vmatmul.mubr.msk.f32.gmra.mxu1 %vm378_vm4, %v825_v34 }
 0x4d0   :  { %v3192_v37 = vpop.f32.mrf.mxu0  ;;  %3213 = vmatprep.mubr.msk.f32.mxu1 %vm3506_vm0, %v3505_v0 }
 0x4d1   :  { %v826_v38 = vmax.f32 %v815_v36, 0.0 }
 0x4d2   :  { %v819_v39 = vpop.f32.mrf.mxu0 }
 0x4d3   :  { %v820_v40 = vadd.f32 %v3744_v43, %v819_v39  ;;  %3214 = vmatmul.mubr.msk.f32.gmra.mxu1 %vm378_vm4, %v826_v38 }
 0x4d4   :  { %v3195_v41 = vpop.f32.mrf.mxu0  ;;  %3216 = vmatprep.mubr.msk.f32.mxu1 %vm3506_vm0, %v3505_v0 }
 0x4d5   :  { %v827_v44 = vmax.f32 %v820_v40, 0.0 }
 0x4d7   :  { %3217 = vmatmul.mubr.msk.f32.gmra.mxu1 %vm378_vm4, %v827_v44 }
 0x4d8   :  { %3242 = vmatprep.mubr.msk.f32.mxu1 %vm3506_vm0, %v3505_v0 }
 0x587   :  { %v917_v46 = vpop.f32.mrf.mxu1 }
 0x588   :  { %v918_v56 = vadd.f32 %v917_v46, %v834_v52 }
 0x589   :  { %v3206_v47 = vpop.f32.mrf.mxu1 }
 0x58a   :  { %v942_v2 = vsel %vm941_vm7, %v918_v56, -inf }
 0x58b   :  { %v922_v48 = vpop.f32.mrf.mxu1 }
 0x58c   :  { %v923_v60 = vadd.f32 %v922_v48, %v834_v52 }
 0x58d   :  { %v3209_v49 = vpop.f32.mrf.mxu1 }
 0x58e   :  { %v943_v14 = vsel %vm941_vm7, %v923_v60, -inf }
 0x58f   :  { %v927_v43 = vpop.f32.mrf.mxu1 }
 0x590   :  { %v928_v61 = vadd.f32 %v927_v43, %v834_v52 }
 0x591   :  { %v3212_v51 = vpop.f32.mrf.mxu1 }
 0x592   :  { %v944_v17 = vsel %vm941_vm7, %v928_v61, -inf }
 0x593   :  { %v932_v53 = vpop.f32.mrf.mxu1 }
 0x594   :  { %v933_v57 = vadd.f32 %v932_v53, %v834_v52 }
 0x595   :  { %v3215_v55 = vpop.f32.mrf.mxu1 }
 0x596   :  { %v945_v7 = vsel %vm941_vm7, %v933_v57, -inf }
 0x597   :  { %v937_v59 = vpop.f32.mrf.mxu1  ;;  %v949_v18 = vmax.f32 %v944_v17, %v945_v7  ;;  %v3855_v7 = vld [vmem:[#allocation2 + $0x10] sm:$0xff] }
 0x598   :  { %v938_v63 = vadd.f32 %v937_v59, %v834_v52 }
 0x599   :  { %v3218_v1 = vpop.f32.mrf.mxu1 }
 0x59a   :  { %v946_v10 = vsel %vm941_vm7, %v938_v63, -inf }
 0x59b   :  { %v947_v13 = vmax.f32 %v942_v2, %v946_v10  ;;  %v3848_v2 = vld [vmem:[#allocation2 + $0x18] sm:$0xff]  ;;  %v3861_v10 = vld [vmem:[#allocation2 + $0x8] sm:$0xff] }
 0x59d   :  { %v948_v19 = vmax.f32 %v947_v13, %v943_v14  ;;  %v3868_v13 = vld [vmem:[#allocation2] sm:$0x7f] }
 0x59e   :  { %v1442_v14 = vld [vmem:[%s4085_s2] sm:$0xff] }
 0x59f   :  { %v950_v23 = vmax.f32 %v948_v19, %v949_v18 }
 0x5a1   :  { %v951_v24 = vrot.slane %v950_v23, 4 }
 0x5a3   :  { %v952_v25 = vmax.f32 %v950_v23, %v951_v24 }
 0x5a5   :  { %v953_v26 = vrot.slane %v952_v25, 2 }
 0x5a7   :  { %v954_v27 = vmax.f32 %v952_v25, %v953_v26 }
 0x5a9   :  { %v955_v28 = vrot.slane %v954_v27, 1 }
 0x5ab   :  { %v956_v29 = vmax.f32 %v954_v27, %v955_v28  ;;  %v3892_v27 = vld [vmem:[#allocation2 + $0x28] ss:$0 sm:$0xff] }
 0x5ad   :  { %v960_v30 = vsub.f32 %v933_v57, %v956_v29  ;;  %v961_v31 = vsub.f32 %v938_v63, %v956_v29  ;;  %v957_v32 = vsub.f32 %v918_v56, %v956_v29  ;;  %v959_v34 = vsub.f32 %v928_v61, %v956_v29  ;;  %v3839_v63 = vld [vmem:[#allocation2 + $0x20] sm:$0xff] }
 0x5ae   :  { %v958_v36 = vsub.f32 %v923_v60, %v956_v29 }
 0x5af   :  { %v968_v33 = vmul.f32 1.442695, %v960_v30  ;;  %v970_v35 = vmul.f32 1.442695, %v961_v31  ;;  %v962_v37 = vmul.f32 1.442695, %v957_v32 }
 0x5b0   :  { %v966_v38 = vmul.f32 1.442695, %v959_v34  ;;  %v964_v39 = vmul.f32 1.442695, %v958_v36 }
 0x5b1   :  { %3438 = vpow2.f32 %v968_v33 }
 0x5b2   :  { %3440 = vpow2.f32 %v970_v35 }
 0x5b3   :  { %3442 = vpow2.f32 %v962_v37 }
 0x5b4   :  { %3444 = vpow2.f32 %v966_v38 }
 0x5b5   :  { %3446 = vpow2.f32 %v964_v39 }
 0x5be   :  { %v3439_v40 = vpop.eup %3438 }
 0x5bf   :  { %v3441_v41 = vpop.eup %3440  ;;  %1059 = vperm.xlu0 %3437, %v3439_v40  }
 0x5c0   :  { %1064 = vperm.xlu1 %3436, %v3441_v41   ;;  %3220 = vmatpush3.msra.mxu0 %v3441_v41  ;;  %v3443_v44 = vpop.eup %3442 }
 0x5c1   :  { %3221 = vmatprep.subr.mxu0 %v3505_v0  ;;  %v3445_v45 = vpop.eup %3444 }
 0x5c2   :  { %3222 = vmatpush3.msra.mxu0 %v3439_v40  ;;  %v3447_v46 = vpop.eup %3446 }
 0x5c3   :  { %3223 = vmatprep.subr.mxu0 %v3505_v0  ;;  %1044 = vperm.xlu0 %3437, %v3443_v44  }
 0x5c4   :  { %1054 = vperm.xlu1 %3436, %v3445_v45   ;;  %3224 = vmatpush3.msra.mxu0 %v3445_v45 }
 0x5c5   :  { %3225 = vmatprep.subr.mxu0 %v3505_v0 }
 0x5c6   :  { %3226 = vmatpush3.msra.mxu0 %v3447_v46 }
 0x5c7   :  { %3227 = vmatprep.subr.mxu0 %v3505_v0 }
 0x5c8   :  { %1049 = vperm.xlu1 %3436, %v3447_v46   ;;  %3228 = vmatpush3.msra.mxu0 %v3443_v44 }
 0x5c9   :  { %3230 = vmatmul.mubr.msk.f32.vlgmr.msra.gmra.mxu0 %vm299_vm5, %v3682_v4  ;;  %3245 = vmatprep.subr.mxu0 %v3505_v0 }
 0x5ca   :  { %3253 = vmatprep.mubr.msk.f32.mxu0 %vm3506_vm0, %v3505_v0 }
 0x5cc   :  { %1161 = vrot.lane.b32.xlu1 %v3742_v42, %s3507_s29 }
 0x5d0   :  { %1159 = vrot.lane.b32.xlu1 %v3767_v20, %s3507_s29 }
 0x5d4   :  { %1155 = vrot.lane.b32.xlu1 %v3775_v22, %s3507_s29 }
 0x63a   :  { %v1060_v48 = vpop.permute.xlu0 %1059 }
 0x63b   :  { %v1065_v47 = vpop.permute.xlu1 %1064  ;;  %v1070_v43 = vmul.f32 %v1060_v48, %v3660_v62 }
 0x63c   :  { %v1071_v49 = vmul.f32 %v1065_v47, %v3666_v3 }
 0x63e   :  { %3233 = vmatpush3.msra.mxu1 %v1071_v49  ;;  %v1045_v42 = vpop.permute.xlu0 %1044 }
 0x63f   :  { %3234 = vmatprep.subr.mxu1 %v3505_v0  ;;  %v1055_v51 = vpop.permute.xlu1 %1054  ;;  %v1067_v3 = vmul.f32 %v1045_v42, %v3642_v50 }
 0x640   :  { %v1069_v52 = vmul.f32 %v1055_v51, %v3654_v58  ;;  %3235 = vmatpush3.msra.mxu1 %v1070_v43  ;;  %v2876_v43 = vld [vmem:[%s4085_s2 + $0x8] sm:$0xff] }
 0x641   :  { %3236 = vmatprep.subr.mxu1 %v3505_v0 }
 0x642   :  { %3237 = vmatpush3.msra.mxu1 %v1069_v52 }
 0x643   :  { %v1050_v20 = vpop.permute.xlu1 %1049  ;;  %3238 = vmatprep.subr.mxu1 %v3505_v0 }
 0x644   :  { %v1068_v22 = vmul.f32 %v1050_v20, %v3648_v54 }
 0x646   :  { %3239 = vmatpush3.msra.mxu1 %v1068_v22 }
 0x647   :  { %3240 = vmatprep.subr.mxu1 %v3505_v0  ;;  %v1162_v62 = vpop.permute.xlu1 %1161 }
 0x648   :  { %3241 = vmatpush3.msra.mxu1 %v1067_v3  ;;  %3246 = vmatpush3.msra.mxu0 %v1162_v62 }
 0x649   :  { %3243 = vmatmul.mubr.msk.f32.vlgmr.msra.gmra.mxu1 %vm299_vm5, %v3682_v4  ;;  %3247 = vmatprep.subr.mxu0 %v3505_v0  ;;  %v1150_v4 = vld [vmem:[#allocation2 + $0x130] sm:$0x3f] }
 0x64a   :  { %3256 = vmatprep.subr.mxu1 %v3505_v0  ;;  %3258 = vmatprep.mubr.msk.f32.mxu1 %vm3506_vm0, %v3505_v0 }
 0x64b   :  { %v1160_v50 = vpop.permute.xlu1 %1159 }
 0x64c   :  { %3248 = vmatpush3.msra.mxu0 %v1160_v50 }
 0x64d   :  { %3249 = vmatprep.subr.mxu0 %v3505_v0 }
 0x64f   :  { %v1156_v60 = vpop.permute.xlu1 %1155 }
 0x689   :  { %v1038_v58 = vpop.f32.mrf.mxu0 }
 0x68a   :  { %3448 = vrcp.f32 %v1038_v58 }
 0x68b   :  { %v3231_v54 = vpop.f32.mrf.mxu0 }
 0x697   :  { %v3449_v53 = vpop.eup %3448 }
 0x698   :  { %1146 = vperm.xlu0 %3437, %v3449_v53  }
 0x69c   :  { %1157 = vrot.lane.b32.xlu0 %v3771_v21, %s3507_s29  ;;  %v3844_v21 = vld [vmem:[%s4084_s1] sm:$0xff] }
 0x6a0   :  { %1241 = vrot.lane.b32.xlu0 %v1150_v4, %s3507_s29 }
 0x709   :  { %v1138_v55 = vpop.f32.mrf.mxu1 }
 0x70b   :  { %v3244_v56 = vpop.f32.mrf.mxu1 }
 0x713   :  { %v1147_v57 = vpop.permute.xlu0 %1146 }
 0x714   :  { %v1149_v61 = vmul.f32 %v1147_v57, %v1138_v55 }
 0x717   :  { %v1158_v59 = vpop.permute.xlu0 %1157 }
 0x718   :  { %3250 = vmatpush3.msra.mxu0 %v1158_v59 }
 0x719   :  { %3251 = vmatprep.subr.mxu0 %v3505_v0 }
 0x71a   :  { %3252 = vmatpush3.msra.mxu0 %v1156_v60 }
 0x71b   :  { %3254 = vmatmul.mubr.msk.f32.vlgmr.msra.gmra.mxu0 %vm378_vm4, %v1149_v61  ;;  %3280 = vmatprep.subr.mxu0 %v3505_v0  ;;  %v1242_v1 = vpop.permute.xlu0 %1241 }
 0x71c   :  { %3257 = vmatpush3.msk.msra.mxu1 %vm1247_vm8, %v1242_v1  ;;  %3281 = vmatpush3.msra.mxu0 %v3839_v63 }
 0x71d   :  { %3259 = vmatmul.mubr.msk.f32.vlgmr.msra.gmra.mxu1 %vm1243_vm9, %v3844_v21  ;;  %3282 = vmatprep.subr.mxu0 %v3505_v0 }
 0x71e   :  { %3283 = vmatpush3.msra.mxu0 %v3848_v2  ;;  %3288 = vmatprep.mubr.msk.f32.mxu0 %vm3506_vm0, %v3505_v0 }
 0x71f   :  { %3284 = vmatprep.subr.mxu0 %v3505_v0  ;;  %3261 = vmatprep.subr.mxu1 %v3505_v0 }
 0x720   :  { %3285 = vmatpush3.msra.mxu0 %v3855_v7  ;;  %3277 = vmatprep.mubr.msk.f32.mxu1 %vm3506_vm0, %v3505_v0 }
 0x721   :  { %3286 = vmatprep.subr.mxu0 %v3505_v0 }
 0x722   :  { %3287 = vmatpush3.msra.mxu0 %v3861_v10 }
 0x723   :  { %3289 = vmatmul.mubr.f32.vlgmr.msra.gmra.mxu0 %v3505_v0  ;;  %3291 = vmatprep.subr.mxu0 %v3505_v0 }
 0x724   :  { %3292 = vmatpush3.msk.msra.mxu0 %vm1520_vm10, %v3868_v13  ;;  %3293 = vmatprep.mubr.msk.f32.mxu0 %vm3506_vm0, %v3505_v0 }
 0x725   :  { %3296 = vmatprep.subr.mxu0 %v3505_v0 }
 0x727   :  { %3294 = vmatmul.mubr.msk.f32.vlgmr.msra.gmra.mxu0 %vm1516_vm11, %v1442_v14 }
 0x728   :  { %3297 = vmatpush3.msra.mxu0 %v3839_v63  ;;  %3304 = vmatprep.mubr.msk.f32.mxu0 %vm3506_vm0, %v3505_v0 }
 0x729   :  { %3298 = vmatprep.subr.mxu0 %v3505_v0 }
 0x72a   :  { %3299 = vmatpush3.msra.mxu0 %v3848_v2 }
 0x72b   :  { %3300 = vmatprep.subr.mxu0 %v3505_v0 }
 0x72c   :  { %3301 = vmatpush3.msra.mxu0 %v3855_v7 }
 0x72d   :  { %3302 = vmatprep.subr.mxu0 %v3505_v0 }
 0x72e   :  { %3303 = vmatpush3.msra.mxu0 %v3861_v10 }
 0x72f   :  { %3323 = vmatprep.subr.mxu0 %v3505_v0 }
 0x7db   :  { %v1236_v17 = vpop.f32.mrf.mxu0 }
 0x7dd   :  { %v3255_v18 = vpop.f32.mrf.mxu0  ;;  %v1316_v19 = vpop.f32.mrf.mxu1 }
 0x7de   :  { %v1317_v23 = vadd.f32 %v1316_v19, %v1236_v17  ;;  %v2880_v17 = vld [vmem:[%s4085_s2 + $0x10] sm:$0xff] }
 0x7df   :  { %v3260_v24 = vpop.f32.mrf.mxu1 }
 0x7e3   :  { %v1512_v25 = vpop.f32.mrf.mxu0 }
 0x7e5   :  { %v3290_v26 = vpop.f32.mrf.mxu0 }
 0x7e7   :  { %v1590_v28 = vpop.f32.mrf.mxu0 }
 0x7e8   :  { %v1591_v29 = vadd.f32 %v1590_v28, %v1512_v25 }
 0x7e9   :  { %v3295_v30 = vpop.f32.mrf.mxu0 }
 0x7ea   :  { %v1598_v31 = vadd.f32 %v3892_v27, %v1591_v29 }
 0x7ec   :  { %3450 = vtanh.f32 %v1598_v31  ;;  %v1599_v33 = vmul.f32 0.5, %v1598_v31 }
 0x7ee   :  { %3452 = vtanh.f32 %v1599_v33 }
 0x7f9   :  { %v3451_v32 = vpop.eup %3450 }
 0x7fa   :  { %1606 = vrot.lane.b32.xlu1 %v3451_v32, %s3507_s29 }
 0x7fb   :  { %v3453_v34 = vpop.eup %3452 }
 0x7fc   :  { %v1601_v35 = vmul.f32 0.5, %v3453_v34 }
 0x7fe   :  { %v1602_v36 = vadd.f32 0.5, %v1601_v35 }
 0x800   :  { %v1604_v39 = vmul.f32 0.0, %v1602_v36 }
 0x86c   :  { %v1607_v37 = vpop.permute.xlu1 %1606 }
 0x86d   :  { %v1609_v38 = vmul.f32 %v1607_v37, %v1602_v36 }
 0x86f   :  { %1611 = vrot.lane.b32.xlu0 %v1609_v38, %s3509_s26 }
 0x873   :  { %1349 = vrot.lane.b32.xlu0 %v3558_v5, %s3507_s29 }
 0x877   :  { %1345 = vrot.lane.b32.xlu0 %v3571_v8, %s3507_s29 }
 0x87b   :  { %1341 = vrot.lane.b32.xlu0 %v3586_v11, %s3507_s29 }
 0x87f   :  { %1337 = vrot.lane.b32.xlu0 %v3611_v15, %s3507_s29 }
 0x8e1   :  { %v1612_v40 = vpop.permute.xlu0 %1611 }
 0x8e2   :  { %v3905_v41 = vadd.f32 %v1612_v40, %v1604_v39 }
 0x8e4   :  { %3454 = vtanh.f32 %v3905_v41 }
 0x8e5   :  { %v1350_v44 = vpop.permute.xlu0 %1349 }
 0x8e6   :  { %3262 = vmatpush3.msra.mxu1 %v1350_v44  ;;  %v2884_v44 = vld [vmem:[%s4085_s2 + $0x18] sm:$0xff] }
 0x8e7   :  { %3263 = vmatprep.subr.mxu1 %v3505_v0 }
 0x8e9   :  { %v1346_v11 = vpop.permute.xlu0 %1345 }
 0x8ed   :  { %v1342_v46 = vpop.permute.xlu0 %1341 }
 0x8f1   :  { %v3455_v5 = vpop.eup %3454  ;;  %v1338_v47 = vpop.permute.xlu0 %1337 }
 0x8f2   :  { %1617 = vrot.lane.b32.xlu1 %v3455_v5, %s3507_s29 }
 0x8f6   :  { %1347 = vrot.lane.b32.xlu1 %v3561_v6, %s3507_s29 }
 0x8fa   :  { %1343 = vrot.lane.b32.xlu1 %v3576_v9, %s3507_s29  ;;  %v3921_v9 = vld [vmem:[#allocation2 + $0x158] ss:$0 sm:$0xff] }
 0x8fe   :  { %1339 = vrot.lane.b32.xlu1 %v3590_v12, %s3507_s29  ;;  %v1325_v12 = vadd.f32 %v3921_v9, %v1317_v23 }
 0x900   :  { %v1326_v48 = vmax.f32 %v1325_v12, 0.0 }
 0x902   :  { %1335 = vrot.lane.b32.xlu1 %v3615_v16, %s3507_s29 }
 0x964   :  { %v1618_v8 = vpop.permute.xlu1 %1617 }
 0x965   :  { %v1620_v15 = vmul.f32 %v1618_v8, %v1602_v36 }
 0x967   :  { %1624 = vrot.lane.b32.xlu0 %v1620_v15, %s3509_s26 }
 0x968   :  { %v1348_v45 = vpop.permute.xlu1 %1347 }
 0x969   :  { %3264 = vmatpush3.msra.mxu1 %v1348_v45 }
 0x96a   :  { %3265 = vmatprep.subr.mxu1 %v3505_v0 }
 0x96b   :  { %3266 = vmatpush3.msra.mxu1 %v1346_v11 }
 0x96c   :  { %3267 = vmatprep.subr.mxu1 %v3505_v0  ;;  %v1344_v6 = vpop.permute.xlu1 %1343 }
 0x96d   :  { %3268 = vmatpush3.msra.mxu1 %v1344_v6 }
 0x96e   :  { %3269 = vmatprep.subr.mxu1 %v3505_v0 }
 0x96f   :  { %3270 = vmatpush3.msra.mxu1 %v1342_v46 }
 0x970   :  { %3271 = vmatprep.subr.mxu1 %v3505_v0  ;;  %v1340_v16 = vpop.permute.xlu1 %1339 }
 0x971   :  { %3272 = vmatpush3.msra.mxu1 %v1340_v16 }
 0x972   :  { %3273 = vmatprep.subr.mxu1 %v3505_v0 }
 0x973   :  { %3274 = vmatpush3.msra.mxu1 %v1338_v47 }
 0x974   :  { %3275 = vmatprep.subr.mxu1 %v3505_v0  ;;  %v1336_v49 = vpop.permute.xlu1 %1335 }
 0x975   :  { %3276 = vmatpush3.msra.mxu1 %v1336_v49 }
 0x976   :  { %3278 = vmatmul.mubr.msk.f32.vlgmr.msra.gmra.mxu1 %vm188_vm3, %v1326_v48  ;;  %3307 = vmatprep.subr.mxu1 %v3505_v0 }
 0x977   :  { %3308 = vmatpush3.msk.msra.mxu1 %vm1520_vm10, %v3868_v13  ;;  %3309 = vmatprep.mubr.msk.f32.mxu1 %vm3506_vm0, %v3505_v0 }
 0x978   :  { %3312 = vmatprep.subr.mxu1 %v3505_v0 }
 0x97a   :  { %3310 = vmatmul.mubr.msk.f32.vlgmr.msra.gmra.mxu1 %vm1516_vm11, %v2876_v43 }
 0x97b   :  { %3313 = vmatpush3.msra.mxu1 %v3839_v63  ;;  %3320 = vmatprep.mubr.msk.f32.mxu1 %vm3506_vm0, %v3505_v0 }
 0x97c   :  { %3314 = vmatprep.subr.mxu1 %v3505_v0 }
 0x97d   :  { %3315 = vmatpush3.msra.mxu1 %v3848_v2 }
 0x97e   :  { %3316 = vmatprep.subr.mxu1 %v3505_v0 }
 0x97f   :  { %3317 = vmatpush3.msra.mxu1 %v3855_v7 }
 0x980   :  { %3318 = vmatprep.subr.mxu1 %v3505_v0 }
 0x981   :  { %3319 = vmatpush3.msra.mxu1 %v3861_v10 }
 0x982   :  { %3339 = vmatprep.subr.mxu1 %v3505_v0 }
 0x9d9   :  { %v1625_v51 = vpop.permute.xlu0 %1624 }
 0x9da   :  { %3305 = vmatmul.mubr.msk.f32.vlgmr.msra.gmra.mxu0 %vm378_vm4, %v1625_v51 }
 0x9db   :  { %3324 = vmatpush3.msk.msra.mxu0 %vm1520_vm10, %v3868_v13  ;;  %3325 = vmatprep.mubr.msk.f32.mxu0 %vm3506_vm0, %v3505_v0 }
 0x9dc   :  { %3328 = vmatprep.subr.mxu0 %v3505_v0 }
 0x9de   :  { %3326 = vmatmul.mubr.msk.f32.vlgmr.msra.gmra.mxu0 %vm1516_vm11, %v2880_v17 }
 0x9df   :  { %3329 = vmatpush3.msra.mxu0 %v3839_v63  ;;  %3336 = vmatprep.mubr.msk.f32.mxu0 %vm3506_vm0, %v3505_v0 }
 0x9e0   :  { %3330 = vmatprep.subr.mxu0 %v3505_v0 }
 0x9e1   :  { %3331 = vmatpush3.msra.mxu0 %v3848_v2 }
 0x9e2   :  { %3332 = vmatprep.subr.mxu0 %v3505_v0 }
 0x9e3   :  { %3333 = vmatpush3.msra.mxu0 %v3855_v7 }
 0x9e4   :  { %3334 = vmatprep.subr.mxu0 %v3505_v0 }
 0x9e5   :  { %3335 = vmatpush3.msra.mxu0 %v3861_v10 }
 0x9e6   :  { %3355 = vmatprep.subr.mxu0 %v3505_v0 }
 0xa36   :  { %v3955_v52 = vpop.f32.mrf.mxu1 }
 0xa38   :  { %v3279_v42 = vpop.f32.mrf.mxu1 }
 0xa3a   :  { %v1767_v20 = vpop.f32.mrf.mxu1 }
 0xa3c   :  { %v3311_v22 = vpop.f32.mrf.mxu1 }
 0xa9a   :  { %v1694_v3 = vpop.f32.mrf.mxu0 }
 0xa9b   :  { %v1768_v62 = vadd.f32 %v1767_v20, %v1694_v3  ;;  %v2888_v20 = vld [vmem:[%s4085_s2 + $0x20] sm:$0xff] }
 0xa9c   :  { %v3306_v58 = vpop.f32.mrf.mxu0 }
 0xa9d   :  { %v1771_v54 = vadd.f32 %v3892_v27, %v1768_v62 }
 0xa9e   :  { %v1940_v24 = vpop.f32.mrf.mxu0 }
 0xa9f   :  { %3456 = vtanh.f32 %v1771_v54  ;;  %v1772_v53 = vmul.f32 0.5, %v1771_v54 }
 0xaa0   :  { %v3327_v25 = vpop.f32.mrf.mxu0 }
 0xaa1   :  { %3458 = vtanh.f32 %v1772_v53  ;;  %v2315_v25 = vld [vmem:[#allocation2 + $0xf8] sm:$0xff] }
 0xaac   :  { %v3457_v50 = vpop.eup %3456 }
 0xaad   :  { %1779 = vrot.lane.b32.xlu1 %v3457_v50, %s3507_s29 }
 0xaae   :  { %v3459_v4 = vpop.eup %3458 }
 0xaaf   :  { %v1774_v55 = vmul.f32 0.5, %v3459_v4 }
 0xab1   :  { %v1775_v56 = vadd.f32 0.5, %v1774_v55 }
 0xab3   :  { %v1777_v60 = vmul.f32 %v1775_v56, %v3905_v41 }
 0xb1f   :  { %v1780_v57 = vpop.permute.xlu1 %1779 }
 0xb20   :  { %v1782_v59 = vmul.f32 %v1780_v57, %v1775_v56 }
 0xb22   :  { %1784 = vrot.lane.b32.xlu0 %v1782_v59, %s3509_s26 }
 0xb94   :  { %v1785_v61 = vpop.permute.xlu0 %1784 }
 0xb95   :  { %v1787_v1 = vadd.f32 %v1785_v61, %v1777_v60 }
 0xb97   :  { %3460 = vtanh.f32 %v1787_v1 }
 0xba4   :  { %v3461_v14 = vpop.eup %3460 }
 0xba5   :  { %1790 = vrot.lane.b32.xlu1 %v3461_v14, %s3507_s29 }
 0xc17   :  { %v1791_v18 = vpop.permute.xlu1 %1790 }
 0xc18   :  { %v1793_v19 = vmul.f32 %v1791_v18, %v1775_v56 }
 0xc1a   :  { %1797 = vrot.lane.b32.xlu0 %v1793_v19, %s3509_s26 }
 0xc8c   :  { %v1798_v23 = vpop.permute.xlu0 %1797 }
 0xc8d   :  { %3321 = vmatmul.mubr.msk.f32.vlgmr.msra.gmra.mxu1 %vm378_vm4, %v1798_v23  ;;  %v2317_v23 = vld [vmem:[#allocation2 + $0x108] sm:$0xff] }
 0xc8e   :  { %3340 = vmatpush3.msk.msra.mxu1 %vm1520_vm10, %v3868_v13  ;;  %3341 = vmatprep.mubr.msk.f32.mxu1 %vm3506_vm0, %v3505_v0 }
 0xc8f   :  { %3344 = vmatprep.subr.mxu1 %v3505_v0 }
 0xc91   :  { %3342 = vmatmul.mubr.msk.f32.vlgmr.msra.gmra.mxu1 %vm1516_vm11, %v2884_v44  ;;  %v2895_v44 = vld [vmem:[#allocation2 + $0x160] ss:$0 sm:$0xff] }
 0xc92   :  { %3345 = vmatpush3.msra.mxu1 %v3839_v63  ;;  %3352 = vmatprep.mubr.msk.f32.mxu1 %vm3506_vm0, %v3505_v0 }
 0xc93   :  { %3346 = vmatprep.subr.mxu1 %v3505_v0 }
 0xc94   :  { %3347 = vmatpush3.msra.mxu1 %v3848_v2 }
 0xc95   :  { %3348 = vmatprep.subr.mxu1 %v3505_v0 }
 0xc96   :  { %3349 = vmatpush3.msra.mxu1 %v3855_v7 }
 0xc97   :  { %3350 = vmatprep.subr.mxu1 %v3505_v0 }
 0xc98   :  { %3351 = vmatpush3.msra.mxu1 %v3861_v10 }
 0xc99   :  { %3371 = vmatprep.subr.mxu1 %v3505_v0 }
 0xd4d   :  { %v1867_v26 = vpop.f32.mrf.mxu1 }
 0xd4e   :  { %v1941_v28 = vadd.f32 %v1940_v24, %v1867_v26  ;;  %v2316_v24 = vld [vmem:[#allocation2 + $0x100] sm:$0xff]  ;;  %v2314_v26 = vld [vmem:[#allocation2 + $0xf0] sm:$0xff] }
 0xd4f   :  { %v3322_v29 = vpop.f32.mrf.mxu1 }
 0xd50   :  { %v1944_v30 = vadd.f32 %v3892_v27, %v1941_v28  ;;  %v2479_v29 = vld [vmem:[#allocation2 + $0xa0] sm:$0xff] }
 0xd51   :  { %v2113_v2 = vpop.f32.mrf.mxu1 }
 0xd52   :  { %3462 = vtanh.f32 %v1944_v30  ;;  %v1945_v32 = vmul.f32 0.5, %v1944_v30 }
 0xd53   :  { %v3343_v7 = vpop.f32.mrf.mxu1 }
 0xd54   :  { %3464 = vtanh.f32 %v1945_v32 }
 0xd5f   :  { %v3463_v31 = vpop.eup %3462 }
 0xd60   :  { %1952 = vrot.lane.b32.xlu1 %v3463_v31, %s3507_s29  ;;  %v2478_v31 = vld [vmem:[#allocation2 + $0x98] sm:$0xff] }
 0xd61   :  { %v3465_v33 = vpop.eup %3464 }
 0xd62   :  { %v1947_v34 = vmul.f32 0.5, %v3465_v33  ;;  %v2477_v33 = vld [vmem:[#allocation2 + $0x90] sm:$0xff] }
 0xd64   :  { %v1948_v35 = vadd.f32 0.5, %v1947_v34  ;;  %v2558_v34 = vld [vmem:[#allocation2 + $0x110] sm:$0xff] }
 0xd66   :  { %v1950_v38 = vmul.f32 %v1948_v35, %v1787_v1 }
 0xdd2   :  { %v1953_v36 = vpop.permute.xlu1 %1952 }
 0xdd3   :  { %v1955_v37 = vmul.f32 %v1953_v36, %v1948_v35 }
 0xdd5   :  { %1957 = vrot.lane.b32.xlu0 %v1955_v37, %s3509_s26  ;;  %v2559_v37 = vld [vmem:[#allocation2 + $0x118] sm:$0xff] }
 0xe47   :  { %v1958_v39 = vpop.permute.xlu0 %1957 }
 0xe48   :  { %v1960_v40 = vadd.f32 %v1958_v39, %v1950_v38 }
 0xe4a   :  { %3466 = vtanh.f32 %v1960_v40 }
 0xe57   :  { %v3467_v41 = vpop.eup %3466 }
 0xe58   :  { %1963 = vrot.lane.b32.xlu1 %v3467_v41, %s3507_s29  ;;  %v2476_v41 = vld [vmem:[#allocation2 + $0x88] sm:$0xff] }
 0xeca   :  { %v1964_v5 = vpop.permute.xlu1 %1963 }
 0xecb   :  { %v1966_v8 = vmul.f32 %v1964_v5, %v1948_v35  ;;  %v2561_v35 = vld [vmem:[#allocation2 + $0x128] sm:$0xff] }
 0xecd   :  { %1970 = vrot.lane.b32.xlu0 %v1966_v8, %s3509_s26  ;;  %v2475_v8 = vld [vmem:[#allocation2 + $0x80] sm:$0xff] }
 0xf3f   :  { %v1971_v63 = vpop.permute.xlu0 %1970 }
 0xf40   :  { %3337 = vmatmul.mubr.msk.f32.vlgmr.msra.gmra.mxu0 %vm378_vm4, %v1971_v63  ;;  %v2473_v63 = vld [vmem:[#allocation2 + $0x70] sm:$0xff] }
 0xf41   :  { %3356 = vmatpush3.msk.msra.mxu0 %vm1520_vm10, %v3868_v13  ;;  %3357 = vmatprep.mubr.msk.f32.mxu0 %vm3506_vm0, %v3505_v0 }
 0xf42   :  { %3360 = vmatprep.subr.mxu0 %v3505_v0 }
 0xf44   :  { %3358 = vmatmul.mubr.msk.f32.vlgmr.msra.gmra.mxu0 %vm1516_vm11, %v2888_v20 }
 0xf45   :  { %3368 = vmatprep.mubr.msk.f32.mxu0 %vm3506_vm0, %v3505_v0  ;;  %3361 = vmatpush3.msra.mxu0 %v2317_v23 }
 0xf46   :  { %3362 = vmatprep.subr.mxu0 %v3505_v0 }
 0xf47   :  { %3363 = vmatpush3.msra.mxu0 %v2316_v24 }
 0xf48   :  { %3364 = vmatprep.subr.mxu0 %v3505_v0 }
 0xf49   :  { %3365 = vmatpush3.msra.mxu0 %v2315_v25 }
 0xf4a   :  { %3366 = vmatprep.subr.mxu0 %v3505_v0 }
 0xf4b   :  { %3367 = vmatpush3.msra.mxu0 %v2314_v26 }
 0xf4c   :  { %3395 = vmatprep.subr.mxu0 %v3505_v0 }
0x1000   :  { %v2040_v10 = vpop.f32.mrf.mxu0 }
0x1001   :  { %v2114_v11 = vadd.f32 %v2113_v2, %v2040_v10 }
0x1002   :  { %v3338_v15 = vpop.f32.mrf.mxu0 }
0x1003   :  { %v2117_v45 = vadd.f32 %v3892_v27, %v2114_v11 }
0x1004   :  { %v2286_v58 = vpop.f32.mrf.mxu0 }
0x1005   :  { %3468 = vtanh.f32 %v2117_v45  ;;  %v2118_v6 = vmul.f32 0.5, %v2117_v45 }
0x1006   :  { %v3359_v54 = vpop.f32.mrf.mxu0 }
0x1007   :  { %3470 = vtanh.f32 %v2118_v6 }
0x1012   :  { %v3469_v46 = vpop.eup %3468 }
0x1013   :  { %2125 = vrot.lane.b32.xlu1 %v3469_v46, %s3507_s29 }
0x1014   :  { %v3471_v12 = vpop.eup %3470 }
0x1015   :  { %v2120_v13 = vmul.f32 0.5, %v3471_v12 }
0x1017   :  { %v2121_v16 = vadd.f32 0.5, %v2120_v13 }
0x1019   :  { %v2123_v49 = vmul.f32 %v2121_v16, %v1960_v40 }
0x1085   :  { %v2126_v47 = vpop.permute.xlu1 %2125 }
0x1086   :  { %v2128_v48 = vmul.f32 %v2126_v47, %v2121_v16 }
0x1088   :  { %2130 = vrot.lane.b32.xlu0 %v2128_v48, %s3509_s26 }
0x10fa   :  { %v2131_v43 = vpop.permute.xlu0 %2130 }
0x10fb   :  { %v2133_v51 = vadd.f32 %v2131_v43, %v2123_v49 }
0x10fd   :  { %3472 = vtanh.f32 %v2133_v51 }
0x110a   :  { %v3473_v42 = vpop.eup %3472 }
0x110b   :  { %2136 = vrot.lane.b32.xlu1 %v3473_v42, %s3507_s29  ;;  %v2899_v42 = vld [vmem:[#allocation2 + $0x168] ss:$0 sm:$0xff] }
0x117d   :  { %v2137_v22 = vpop.permute.xlu1 %2136 }
0x117e   :  { %v2139_v3 = vmul.f32 %v2137_v22, %v2121_v16 }
0x1180   :  { %2143 = vrot.lane.b32.xlu0 %v2139_v3, %s3509_s26 }
0x11f2   :  { %v2144_v62 = vpop.permute.xlu0 %2143 }
0x11f3   :  { %3353 = vmatmul.mubr.msk.f32.vlgmr.msra.gmra.mxu1 %vm378_vm4, %v2144_v62 }
0x11f4   :  { %3373 = vmatprep.mubr.msk.f32.mxu1 %vm3506_vm0, %v3505_v0 }
0x12b3   :  { %v2213_v50 = vpop.f32.mrf.mxu1 }
0x12b4   :  { %v2287_v53 = vadd.f32 %v2286_v58, %v2213_v50 }
0x12b5   :  { %v3354_v4 = vpop.f32.mrf.mxu1 }
0x12b6   :  { %v2290_v55 = vadd.f32 %v3892_v27, %v2287_v53  ;;  %v2313_v27 = vld [vmem:[#allocation2 + $0x140] sm:$0x3f] }
0x12b7   :  { %3372 = vmatpush3.msk.msra.mxu1 %vm1247_vm8, %v2313_v27 }
0x12b8   :  { %3474 = vtanh.f32 %v2290_v55  ;;  %v2291_v57 = vmul.f32 0.5, %v2290_v55  ;;  %3374 = vmatmul.mubr.msk.f32.vlgmr.msra.gmra.mxu1 %vm1243_vm9, %v3844_v21  ;;  %3376 = vmatprep.subr.mxu1 %v3505_v0  ;;  %v2480_v21 = vld [vmem:[#allocation2 + $0xa8] sm:$0xff] }
0x12b9   :  { %3392 = vmatprep.mubr.msk.f32.mxu1 %vm3506_vm0, %v3505_v0  ;;  %3377 = vmatpush3.msra.mxu1 %v2480_v21 }
0x12ba   :  { %3476 = vtanh.f32 %v2291_v57  ;;  %3378 = vmatprep.subr.mxu1 %v3505_v0 }
0x12bb   :  { %3379 = vmatpush3.msra.mxu1 %v2479_v29 }
0x12bc   :  { %3380 = vmatprep.subr.mxu1 %v3505_v0 }
0x12bd   :  { %3381 = vmatpush3.msra.mxu1 %v2478_v31 }
0x12be   :  { %3382 = vmatprep.subr.mxu1 %v3505_v0 }
0x12bf   :  { %3383 = vmatpush3.msra.mxu1 %v2477_v33 }
0x12c0   :  { %3384 = vmatprep.subr.mxu1 %v3505_v0 }
0x12c1   :  { %3385 = vmatpush3.msra.mxu1 %v2476_v41 }
0x12c2   :  { %3386 = vmatprep.subr.mxu1 %v3505_v0 }
0x12c3   :  { %3387 = vmatpush3.msra.mxu1 %v2475_v8 }
0x12c4   :  { %3388 = vmatprep.subr.mxu1 %v3505_v0 }
0x12c5   :  { %v3475_v56 = vpop.eup %3474 }
0x12c6   :  { %2298 = vrot.lane.b32.xlu1 %v3475_v56, %s3507_s29 }
0x12c7   :  { %v3477_v59 = vpop.eup %3476 }
0x12c8   :  { %v2293_v60 = vmul.f32 0.5, %v3477_v59 }
0x12ca   :  { %v2294_v61 = vadd.f32 0.5, %v2293_v60 }
0x12cc   :  { %v2296_v17 = vmul.f32 %v2294_v61, %v2133_v51 }
0x1338   :  { %v2299_v1 = vpop.permute.xlu1 %2298 }
0x1339   :  { %v2301_v14 = vmul.f32 %v2299_v1, %v2294_v61 }
0x133b   :  { %2303 = vrot.lane.b32.xlu0 %v2301_v14, %s3509_s26 }
0x1378   :  { %v2462_v40 = vpop.f32.mrf.mxu1 }
0x137a   :  { %v3375_v5 = vpop.f32.mrf.mxu1 }
0x13ad   :  { %v2304_v18 = vpop.permute.xlu0 %2303 }
0x13ae   :  { %v2306_v19 = vadd.f32 %v2304_v18, %v2296_v17 }
0x13b0   :  { %3478 = vtanh.f32 %v2306_v19 }
0x13bd   :  { %v3479_v28 = vpop.eup %3478 }
0x13be   :  { %2309 = vrot.lane.b32.xlu1 %v3479_v28, %s3507_s29 }
0x13c2   :  { %1360 = vrot.lane.b32.xlu1 %v3921_v9, %s3507_s29  ;;  %v2560_v9 = vld [vmem:[#allocation2 + $0x120] sm:$0xff] }
0x13c6   :  { %2643 = vrot.lane.b32.xlu1 %v2316_v24, %s3507_s29 }
0x13ca   :  { %2482 = vrot.lane.b32.xlu1 %v2895_v44, %s3507_s29 }
0x13ce   :  { %2741 = vrot.lane.b32.xlu1 %v2561_v35, %s3507_s29 }
0x13d2   :  { %2737 = vrot.lane.b32.xlu1 %v2559_v37, %s3507_s29 }
0x13d6   :  { %2748 = vrot.lane.b32.xlu1 %v2899_v42, %s3507_s29 }
0x1430   :  { %v2310_v30 = vpop.permute.xlu1 %2309 }
0x1431   :  { %v2312_v32 = vmul.f32 %v2310_v30, %v2294_v61 }
0x1433   :  { %2319 = vrot.lane.b32.xlu0 %v2312_v32, %s3509_s26 }
0x1434   :  { %v1361_v38 = vpop.permute.xlu1 %1360 }
0x1435   :  { %v1433_v39 = vadd.f32 %v3955_v52, %v1361_v38  ;;  %v2474_v52 = vld [vmem:[#allocation2 + $0x78] sm:$0xff] }
0x1436   :  { %3389 = vmatpush3.msra.mxu1 %v2474_v52 }
0x1437   :  { %2645 = vrot.lane.b32.xlu0 %v2317_v23, %s3507_s29  ;;  %3390 = vmatprep.subr.mxu1 %v3505_v0 }
0x1438   :  { %3391 = vmatpush3.msra.mxu1 %v2473_v63  ;;  %v2644_v7 = vpop.permute.xlu1 %2643 }
0x1439   :  { %3417 = vmatprep.subr.mxu1 %v3505_v0 }
0x143b   :  { %2641 = vrot.lane.b32.xlu0 %v2315_v25, %s3507_s29 }
0x143c   :  { %v2483_v16 = vpop.permute.xlu1 %2482 }
0x143f   :  { %2639 = vrot.lane.b32.xlu0 %v2314_v26, %s3507_s29 }
0x1440   :  { %v2742_v48 = vpop.permute.xlu1 %2741 }
0x1443   :  { %2739 = vrot.lane.b32.xlu0 %v2560_v9, %s3507_s29 }
0x1444   :  { %v2738_v22 = vpop.permute.xlu1 %2737 }
0x1447   :  { %2735 = vrot.lane.b32.xlu0 %v2558_v34, %s3507_s29 }
0x1448   :  { %v2749_v4 = vpop.permute.xlu1 %2748 }
0x14a5   :  { %v2320_v36 = vpop.permute.xlu0 %2319 }
0x14a6   :  { %3369 = vmatmul.mubr.msk.f32.vlgmr.msra.gmra.mxu0 %vm378_vm4, %v2320_v36 }
0x14a7   :  { %3396 = vmatpush3.msra.mxu0 %v2561_v35  ;;  %3403 = vmatprep.mubr.msk.f32.mxu0 %vm3506_vm0, %v3505_v0 }
0x14a8   :  { %3397 = vmatprep.subr.mxu0 %v3505_v0 }
0x14a9   :  { %3398 = vmatpush3.msra.mxu0 %v2560_v9  ;;  %v2646_v2 = vpop.permute.xlu0 %2645 }
0x14aa   :  { %3399 = vmatprep.subr.mxu0 %v3505_v0 }
0x14ab   :  { %3400 = vmatpush3.msra.mxu0 %v2559_v37 }
0x14ac   :  { %3401 = vmatprep.subr.mxu0 %v3505_v0 }
0x14ad   :  { %3402 = vmatpush3.msra.mxu0 %v2558_v34  ;;  %v2642_v10 = vpop.permute.xlu0 %2641 }
0x14ae   :  { %3404 = vmatmul.mubr.msk.f32.vlgmr.msra.gmra.mxu0 %vm378_vm4, %v1433_v39  ;;  %3406 = vmatprep.subr.mxu0 %v3505_v0 }
0x14af   :  { %3414 = vmatprep.mubr.msk.f32.mxu0 %vm3506_vm0, %v3505_v0  ;;  %3407 = vmatpush3.msra.mxu0 %v2646_v2 }
0x14b0   :  { %3408 = vmatprep.subr.mxu0 %v3505_v0 }
0x14b1   :  { %3409 = vmatpush3.msra.mxu0 %v2644_v7  ;;  %v2640_v47 = vpop.permute.xlu0 %2639 }
0x14b2   :  { %3410 = vmatprep.subr.mxu0 %v3505_v0 }
0x14b3   :  { %3411 = vmatpush3.msra.mxu0 %v2642_v10 }
0x14b4   :  { %3412 = vmatprep.subr.mxu0 %v3505_v0 }
0x14b5   :  { %3413 = vmatpush3.msra.mxu0 %v2640_v47  ;;  %v2740_v20 = vpop.permute.xlu0 %2739 }
0x14b9   :  { %v2736_v3 = vpop.permute.xlu0 %2735 }
0x1566   :  { %v2389_v11 = vpop.f32.mrf.mxu0 }
0x1567   :  { %v2463_v15 = vadd.f32 %v2462_v40, %v2389_v11 }
0x1568   :  { %v3370_v45 = vpop.f32.mrf.mxu0 }
0x1569   :  { %v2471_v46 = vadd.f32 %v2895_v44, %v2463_v15 }
0x156b   :  { %v2472_v6 = vmax.f32 %v2471_v46, 0.0 }
0x156d   :  { %3393 = vmatmul.mubr.msk.f32.vlgmr.msra.gmra.mxu1 %vm188_vm3, %v2472_v6 }
0x156e   :  { %v2631_v12 = vpop.f32.mrf.mxu0  ;;  %3425 = vmatprep.mubr.msk.f32.mxu1 %vm3506_vm0, %v3505_v0  ;;  %3418 = vmatpush3.msra.mxu1 %v2742_v48 }
0x156f   :  { %3419 = vmatprep.subr.mxu1 %v3505_v0 }
0x1570   :  { %v3405_v13 = vpop.f32.mrf.mxu0  ;;  %3420 = vmatpush3.msra.mxu1 %v2740_v20 }
0x1571   :  { %3421 = vmatprep.subr.mxu1 %v3505_v0 }
0x1572   :  { %3422 = vmatpush3.msra.mxu1 %v2738_v22 }
0x1573   :  { %3423 = vmatprep.subr.mxu1 %v3505_v0 }
0x1574   :  { %3424 = vmatpush3.msra.mxu1 %v2736_v3 }
0x162d   :  { %v2554_v49 = vpop.f32.mrf.mxu1 }
0x162e   :  { %v2555_v43 = vadd.f32 %v2554_v49, %v2483_v16 }
0x162f   :  { %v3394_v51 = vpop.f32.mrf.mxu1 }
0x1630   :  { %3415 = vmatmul.mubr.msk.f32.vlgmr.msra.gmra.mxu0 %vm378_vm4, %v2555_v43 }
0x16f0   :  { %v2720_v62 = vpop.f32.mrf.mxu0 }
0x16f1   :  { %v2721_v58 = vadd.f32 %v2720_v62, %v2631_v12 }
0x16f2   :  { %v3416_v54 = vpop.f32.mrf.mxu0 }
0x16f3   :  { %v2729_v50 = vadd.f32 %v2899_v42, %v2721_v58 }
0x16f5   :  { %v2730_v53 = vmax.f32 %v2729_v50, 0.0 }
0x16f7   :  { %3426 = vmatmul.mubr.msk.f32.vlgmr.msra.gmra.mxu1 %vm378_vm4, %v2730_v53 }
0x17b7   :  { %v2820_v55 = vpop.f32.mrf.mxu1 }
0x17b8   :  { %v2821_v56 = vadd.f32 %v2820_v55, %v2749_v4 }
0x17b9   :  { %v3427_v57 = vpop.f32.mrf.mxu1 }
0x17ba   :  { %2824 = vst.msk [vmem:[%s4089_s6] sm:$0xff] %vm941_vm7, %v2821_v56 }
0x17bb   :  { %2829 = vsyncpa [#allocation3], 1 }

</bundles_post_ra>
